<compile_context>
chip_gen: v7x
topology: tpu7x:2x2x1
jax: 0.10.0
libtpu: 0.0.40
codegen_flags: <defaults>
</compile_context>

<pallas_src>
import jax
import jax.numpy as jnp
from jax import lax
from jax.experimental import pallas as pl
from jax.experimental.pallas import tpu as pltpu


_LANE = 128      # output channels padded to this (lane-dense stores)
_TM_MAX = 512    # max rows per grid step (good DMA/compute overlap, tiny VMEM use)


def _round_up(x, m):
    return (x + m - 1) // m * m


# ----------------------------- Pallas kernels ------------------------------

def _conv_block_kernel(p_ref, w_ref, bss_ref, o_ref):
    # patches @ weight on the MXU: bf16 inputs, f32 accumulation.
    acc = jnp.dot(p_ref[...], w_ref[...], preferred_element_type=jnp.float32)
    acc = acc + bss_ref[0:1, :]                       # conv bias
    acc = jnp.where(acc >= 0.0, acc, 0.2 * acc)       # LeakyReLU(0.2)
    # TODO(synk): Dropout2d(0.25) is stochastic in train mode; eval-mode identity here.
    acc = acc * bss_ref[1:2, :] + bss_ref[2:3, :]     # folded BatchNorm2d(eps=0.8) affine
    o_ref[...] = acc.astype(o_ref.dtype)


def _linear_sigmoid_kernel(x_ref, w_ref, b_ref, o_ref):
    acc = jnp.dot(x_ref[...], w_ref[...], preferred_element_type=jnp.float32)
    acc = acc + b_ref[...]
    o_ref[...] = (1.0 / (1.0 + jnp.exp(-acc))).astype(o_ref.dtype)


# ------------------------------ Pallas wrappers -----------------------------

def conv_block(patches, w_mat, bias, scale, shift):
    """patches [M, K] f32, w_mat [K, Cout] f32 -> fused block output [M, Cout] f32."""
    M, K = patches.shape
    Cout = w_mat.shape[1]
    CP = _round_up(Cout, _LANE)                 # lane-dense output width (128)

    # Row tile: big enough to pipeline, multiple of 8, covering M exactly after padding.
    TM = _TM_MAX if M >= _TM_MAX else _round_up(M, 8)
    MP = _round_up(M, TM)

    p = patches
    if MP != M:
        p = jnp.pad(p, ((0, MP - M), (0, 0)))
    p = p.astype(jnp.bfloat16)                  # bf16 matmul inputs, f32 accumulate

    w = jnp.pad(w_mat, ((0, 0), (0, CP - Cout))).astype(jnp.bfloat16)
    # Coalesced epilogue operand: row 0 = bias, row 1 = BN scale, row 2 = BN shift.
    bss = jnp.stack(
        [jnp.pad(bias, (0, CP - Cout)),
         jnp.pad(scale, (0, CP - Cout)),
         jnp.pad(shift, (0, CP - Cout))], axis=0).astype(jnp.float32)

    out = pl.pallas_call(
        _conv_block_kernel,
        out_shape=jax.ShapeDtypeStruct((MP, CP), jnp.float32),
        grid=(MP // TM,),
        in_specs=[
            pl.BlockSpec((TM, K), lambda i: (i, 0)),
            pl.BlockSpec((K, CP), lambda i: (0, 0)),
            pl.BlockSpec((3, CP), lambda i: (0, 0)),
        ],
        out_specs=pl.BlockSpec((TM, CP), lambda i: (i, 0)),
        compiler_params=pltpu.CompilerParams(
            dimension_semantics=("parallel",)),
    )(p, w, bss)
    return out[:M, :Cout]


def linear_sigmoid(x, w, b):
    N, F = x.shape
    O = w.shape[1]
    xb = x.astype(jnp.bfloat16)
    wb = w.astype(jnp.bfloat16)
    b2 = b.reshape(1, O).astype(jnp.float32)
    return pl.pallas_call(
        _linear_sigmoid_kernel,
        out_shape=jax.ShapeDtypeStruct((N, O), jnp.float32),
        grid=(1,),
        in_specs=[
            pl.BlockSpec((N, F), lambda i: (0, 0)),
            pl.BlockSpec((F, O), lambda i: (0, 0)),
            pl.BlockSpec((1, O), lambda i: (0, 0)),
        ],
        out_specs=pl.BlockSpec((N, O), lambda i: (0, 0)),
    )(xb, wb, b2)


# ------------------------------- JAX glue ----------------------------------

def im2col_nhwc(x, k=3, stride=2, pad=1):
    """x: [N, H, W, C] -> patches [N*Ho*Wo, k*k*C].
    Row order (n, ho, wo); column order (kh, kw, c) — must match the weight
    flattening w.transpose(2, 3, 1, 0).reshape(k*k*Cin, Cout)."""
    N, H, W, C = x.shape
    Ho = (H + 2 * pad - k) // stride + 1
    Wo = (W + 2 * pad - k) // stride + 1
    xp = jnp.pad(x, ((0, 0), (pad, pad), (pad, pad), (0, 0)))
    taps = [xp[:, kh:kh + stride * Ho:stride, kw:kw + stride * Wo:stride, :]
            for kh in range(k) for kw in range(k)]
    p = jnp.concatenate(taps, axis=-1)               # [N, Ho, Wo, k*k*C]
    return p.reshape(N * Ho * Wo, k * k * C), Ho, Wo


def discriminator_forward(img, params):
    x = jnp.transpose(img, (0, 2, 3, 1))             # NCHW -> NHWC, once
    for blk in params["blocks"]:
        N = x.shape[0]
        patches, Ho, Wo = im2col_nhwc(x)
        cout = blk["w"].shape[0]
        # OIHW -> rows in (kh, kw, cin) order, columns = cout (matches im2col).
        w_mat = jnp.transpose(blk["w"], (2, 3, 1, 0)).reshape(-1, cout)
        out = conv_block(patches, w_mat, blk["b"], blk["scale"], blk["shift"])
        x = out.reshape(N, Ho, Wo, cout)             # stay NHWC between blocks
    # PyTorch .view(N, -1) flattens in (C, H, W) order; the final activation is
    # tiny (N x ds x ds x 128), so this transpose is negligible.
    feat = jnp.transpose(x, (0, 3, 1, 2)).reshape(x.shape[0], -1)
    return linear_sigmoid(feat, params["fc_w"], params["fc_b"])


# ------------------------ deterministic parameter init ----------------------

def init_params(key, channels, img_size):
    chans = [channels, 16, 32, 64, 128]
    use_bn = [False, True, True, True]
    eps = 0.8  # nn.BatchNorm2d(out_filters, 0.8): second positional arg is eps
    keys = jax.random.split(key, 2 * len(use_bn) + 1)
    blocks = []
    for i in range(4):
        cin, cout = chans[i], chans[i + 1]
        w = jax.random.normal(keys[2 * i], (cout, cin, 3, 3), jnp.float32) * 0.1
        b = jax.random.normal(keys[2 * i + 1], (cout,), jnp.float32) * 0.01
        if use_bn[i]:
            gamma = jnp.ones((cout,), jnp.float32)    # fresh-module BN defaults
            beta = jnp.zeros((cout,), jnp.float32)
            r_mean = jnp.zeros((cout,), jnp.float32)
            r_var = jnp.ones((cout,), jnp.float32)
            scale = gamma / jnp.sqrt(r_var + eps)
            shift = beta - r_mean * scale
        else:
            scale = jnp.ones((cout,), jnp.float32)
            shift = jnp.zeros((cout,), jnp.float32)
        blocks.append(dict(w=w, b=b, scale=scale, shift=shift))
    ds = img_size // (2 ** 4)
    feat = 128 * ds * ds
    fc_w = jax.random.normal(keys[-1], (feat, 1), jnp.float32) * 0.05
    fc_b = jnp.zeros((1,), jnp.float32)
    return dict(blocks=blocks, fc_w=fc_w, fc_b=fc_b)


# ------------------------------ pure-JAX reference ---------------------------

def reference_forward(img, params):
    # Mirrors the kernel numerics: bf16 matmul/conv inputs, f32 accumulation,
    # f32 bias / LeakyReLU / folded-BN epilogue.
    x = img
    for blk in params["blocks"]:
        y = lax.conv_general_dilated(
            x.astype(jnp.bfloat16), blk["w"].astype(jnp.bfloat16),
            (2, 2), ((1, 1), (1, 1)),
            dimension_numbers=("NCHW", "OIHW", "NCHW"),
            preferred_element_type=jnp.float32)
        y = y + blk["b"][None, :, None, None]
        y = jnp.where(y >= 0, y, 0.2 * y)
        y = y * blk["scale"][None, :, None, None] + blk["shift"][None, :, None, None]
        x = y
    feat = x.reshape(x.shape[0], -1)
    logits = jnp.dot(feat.astype(jnp.bfloat16), params["fc_w"].astype(jnp.bfloat16),
                     preferred_element_type=jnp.float32) + params["fc_b"][None, :]
    return jax.nn.sigmoid(logits)


# ---------------------------------- main ------------------------------------

if __name__ == "__main__":
    key = jax.random.PRNGKey(0)
    k_img, k_par = jax.random.split(key)

    N, C, IMG = 4, 1, 32            # opt.channels = 1, opt.img_size = 32
    img = jax.random.normal(k_img, (N, C, IMG, IMG), jnp.float32)
    params = init_params(k_par, C, IMG)

    validity = jax.jit(discriminator_forward)(img, params)
    validity = jax.block_until_ready(validity)

    assert validity.shape == (N, 1), validity.shape
    ref = reference_forward(img, params)
    if not bool(jnp.allclose(validity, ref, atol=2e-3, rtol=2e-3)):
        raise AssertionError(f"mismatch: pallas={validity}, ref={ref}")

    print("KERNEL_OK")
</pallas_src>

<mosaic_0001>
module attributes {stable_mosaic.version = 11 : i64} {
  func.func @_conv_block_kernel(%arg0: i32, %arg1: memref<512x9xbf16, #tpu.memory_space<vmem>>, %arg2: memref<9x128xbf16, #tpu.memory_space<vmem>>, %arg3: memref<3x128xf32, #tpu.memory_space<vmem>>, %arg4: memref<512x128xf32, #tpu.memory_space<vmem>>) attributes {dimension_semantics = [#tpu.dimension_semantics<parallel>], iteration_bounds = array<i64: 2>, scalar_prefetch = 0 : i64, scratch_operands = 0 : i64, tpu.core_type = #tpu.core_type<tc>, window_params = [{transform_indices = @transform_0, window_bounds = array<i64: 512, 9>}, {pipeline_mode = #tpu.pipeline_mode<synchronous>, transform_indices = @transform_1, window_bounds = array<i64: 9, 128>}, {pipeline_mode = #tpu.pipeline_mode<synchronous>, transform_indices = @transform_2, window_bounds = array<i64: 3, 128>}, {transform_indices = @transform_3, window_bounds = array<i64: 512, 128>}]} {
    %c0 = arith.constant 0 : index
    %c0_0 = arith.constant 0 : index
    %0 = vector.load %arg1[%c0, %c0_0] : memref<512x9xbf16, #tpu.memory_space<vmem>>, vector<512x9xbf16>
    %c0_1 = arith.constant 0 : index
    %c0_2 = arith.constant 0 : index
    %1 = vector.load %arg2[%c0_1, %c0_2] : memref<9x128xbf16, #tpu.memory_space<vmem>>, vector<9x128xbf16>
    %cst = arith.constant dense<0.000000e+00> : vector<512x128xf32>
    %2 = tpu.matmul %0, %1, %cst {dimension_numbers = #tpu.dot_dimension_numbers<[1], [0], [0], [1], [0, 0, 1, 1], [], []>} : vector<512x9xbf16>, vector<9x128xbf16>, vector<512x128xf32> -> vector<512x128xf32>
    %c0_3 = arith.constant 0 : index
    %c0_4 = arith.constant 0 : index
    %3 = vector.load %arg3[%c0_3, %c0_4] : memref<3x128xf32, #tpu.memory_space<vmem>>, vector<1x128xf32>
    %4 = vector.broadcast %3 : vector<1x128xf32> to vector<512x128xf32>
    %5 = arith.addf %2, %4 : vector<512x128xf32>
    %cst_5 = arith.constant 0.000000e+00 : f32
    %6 = vector.broadcast %cst_5 : f32 to vector<512x128xf32>
    %7 = arith.cmpf oge, %5, %6 : vector<512x128xf32>
    %cst_6 = arith.constant 2.000000e-01 : f32
    %8 = vector.broadcast %cst_6 : f32 to vector<512x128xf32>
    %9 = arith.mulf %8, %5 : vector<512x128xf32>
    %10 = arith.select %7, %5, %9 : vector<512x128xi1>, vector<512x128xf32>
    %c1 = arith.constant 1 : index
    %c0_7 = arith.constant 0 : index
    %11 = vector.load %arg3[%c1, %c0_7] : memref<3x128xf32, #tpu.memory_space<vmem>>, vector<1x128xf32>
    %12 = vector.broadcast %11 : vector<1x128xf32> to vector<512x128xf32>
    %13 = arith.mulf %10, %12 : vector<512x128xf32>
    %c2 = arith.constant 2 : index
    %c0_8 = arith.constant 0 : index
    %14 = vector.load %arg3[%c2, %c0_8] : memref<3x128xf32, #tpu.memory_space<vmem>>, vector<1x128xf32>
    %15 = vector.broadcast %14 : vector<1x128xf32> to vector<512x128xf32>
    %16 = arith.addf %13, %15 : vector<512x128xf32>
    %c0_9 = arith.constant 0 : index
    %c0_10 = arith.constant 0 : index
    %17 = vector.load %arg4[%c0_9, %c0_10] : memref<512x128xf32, #tpu.memory_space<vmem>>, vector<512x128xf32>
    tpu.vector_store %arg4[%c0_9, %c0_10], %16 {strides = array<i32>} : memref<512x128xf32, #tpu.memory_space<vmem>>, vector<512x128xf32>,
    return
  }
  func.func @transform_0(%arg0: i32) -> (i32, i32) {
    %c0_i32 = arith.constant 0 : i32
    %c0_i32_0 = arith.constant 0 : i32
    return %arg0, %c0_i32 : i32, i32
  }
  func.func @transform_1(%arg0: i32) -> (i32, i32) {
    %c0_i32 = arith.constant 0 : i32
    %c0_i32_0 = arith.constant 0 : i32
    %c0_i32_1 = arith.constant 0 : i32
    return %c0_i32, %c0_i32_0 : i32, i32
  }
  func.func @transform_2(%arg0: i32) -> (i32, i32) {
    %c0_i32 = arith.constant 0 : i32
    %c0_i32_0 = arith.constant 0 : i32
    %c0_i32_1 = arith.constant 0 : i32
    return %c0_i32, %c0_i32_0 : i32, i32
  }
  func.func @transform_3(%arg0: i32) -> (i32, i32) {
    %c0_i32 = arith.constant 0 : i32
    %c0_i32_0 = arith.constant 0 : i32
    return %arg0, %c0_i32 : i32, i32
  }
}

module attributes {stable_mosaic.version = 11 : i64} {
  func.func @_conv_block_kernel(%arg0: i32, %arg1: memref<256x144xbf16, #tpu.memory_space<vmem>>, %arg2: memref<144x128xbf16, #tpu.memory_space<vmem>>, %arg3: memref<3x128xf32, #tpu.memory_space<vmem>>, %arg4: memref<256x128xf32, #tpu.memory_space<vmem>>) attributes {dimension_semantics = [#tpu.dimension_semantics<parallel>], iteration_bounds = array<i64: 1>, scalar_prefetch = 0 : i64, scratch_operands = 0 : i64, tpu.core_type = #tpu.core_type<tc>, window_params = [{transform_indices = @transform_0, window_bounds = array<i64: 256, 144>}, {pipeline_mode = #tpu.pipeline_mode<synchronous>, transform_indices = @transform_1, window_bounds = array<i64: 144, 128>}, {pipeline_mode = #tpu.pipeline_mode<synchronous>, transform_indices = @transform_2, window_bounds = array<i64: 3, 128>}, {transform_indices = @transform_3, window_bounds = array<i64: 256, 128>}]} {
    %c0 = arith.constant 0 : index
    %c0_0 = arith.constant 0 : index
    %0 = vector.load %arg1[%c0, %c0_0] : memref<256x144xbf16, #tpu.memory_space<vmem>>, vector<256x144xbf16>
    %c0_1 = arith.constant 0 : index
    %c0_2 = arith.constant 0 : index
    %1 = vector.load %arg2[%c0_1, %c0_2] : memref<144x128xbf16, #tpu.memory_space<vmem>>, vector<144x128xbf16>
    %cst = arith.constant dense<0.000000e+00> : vector<256x128xf32>
    %2 = tpu.matmul %0, %1, %cst {dimension_numbers = #tpu.dot_dimension_numbers<[1], [0], [0], [1], [0, 0, 1, 1], [], []>} : vector<256x144xbf16>, vector<144x128xbf16>, vector<256x128xf32> -> vector<256x128xf32>
    %c0_3 = arith.constant 0 : index
    %c0_4 = arith.constant 0 : index
    %3 = vector.load %arg3[%c0_3, %c0_4] : memref<3x128xf32, #tpu.memory_space<vmem>>, vector<1x128xf32>
    %4 = vector.broadcast %3 : vector<1x128xf32> to vector<256x128xf32>
    %5 = arith.addf %2, %4 : vector<256x128xf32>
    %cst_5 = arith.constant 0.000000e+00 : f32
    %6 = vector.broadcast %cst_5 : f32 to vector<256x128xf32>
    %7 = arith.cmpf oge, %5, %6 : vector<256x128xf32>
    %cst_6 = arith.constant 2.000000e-01 : f32
    %8 = vector.broadcast %cst_6 : f32 to vector<256x128xf32>
    %9 = arith.mulf %8, %5 : vector<256x128xf32>
    %10 = arith.select %7, %5, %9 : vector<256x128xi1>, vector<256x128xf32>
    %c1 = arith.constant 1 : index
    %c0_7 = arith.constant 0 : index
    %11 = vector.load %arg3[%c1, %c0_7] : memref<3x128xf32, #tpu.memory_space<vmem>>, vector<1x128xf32>
    %12 = vector.broadcast %11 : vector<1x128xf32> to vector<256x128xf32>
    %13 = arith.mulf %10, %12 : vector<256x128xf32>
    %c2 = arith.constant 2 : index
    %c0_8 = arith.constant 0 : index
    %14 = vector.load %arg3[%c2, %c0_8] : memref<3x128xf32, #tpu.memory_space<vmem>>, vector<1x128xf32>
    %15 = vector.broadcast %14 : vector<1x128xf32> to vector<256x128xf32>
    %16 = arith.addf %13, %15 : vector<256x128xf32>
    %c0_9 = arith.constant 0 : index
    %c0_10 = arith.constant 0 : index
    %17 = vector.load %arg4[%c0_9, %c0_10] : memref<256x128xf32, #tpu.memory_space<vmem>>, vector<256x128xf32>
    tpu.vector_store %arg4[%c0_9, %c0_10], %16 {strides = array<i32>} : memref<256x128xf32, #tpu.memory_space<vmem>>, vector<256x128xf32>,
    return
  }
  func.func @transform_0(%arg0: i32) -> (i32, i32) {
    %c0_i32 = arith.constant 0 : i32
    %c0_i32_0 = arith.constant 0 : i32
    return %arg0, %c0_i32 : i32, i32
  }
  func.func @transform_1(%arg0: i32) -> (i32, i32) {
    %c0_i32 = arith.constant 0 : i32
    %c0_i32_0 = arith.constant 0 : i32
    %c0_i32_1 = arith.constant 0 : i32
    return %c0_i32, %c0_i32_0 : i32, i32
  }
  func.func @transform_2(%arg0: i32) -> (i32, i32) {
    %c0_i32 = arith.constant 0 : i32
    %c0_i32_0 = arith.constant 0 : i32
    %c0_i32_1 = arith.constant 0 : i32
    return %c0_i32, %c0_i32_0 : i32, i32
  }
  func.func @transform_3(%arg0: i32) -> (i32, i32) {
    %c0_i32 = arith.constant 0 : i32
    %c0_i32_0 = arith.constant 0 : i32
    return %arg0, %c0_i32 : i32, i32
  }
}

module attributes {stable_mosaic.version = 11 : i64} {
  func.func @_conv_block_kernel(%arg0: i32, %arg1: memref<64x288xbf16, #tpu.memory_space<vmem>>, %arg2: memref<288x128xbf16, #tpu.memory_space<vmem>>, %arg3: memref<3x128xf32, #tpu.memory_space<vmem>>, %arg4: memref<64x128xf32, #tpu.memory_space<vmem>>) attributes {dimension_semantics = [#tpu.dimension_semantics<parallel>], iteration_bounds = array<i64: 1>, scalar_prefetch = 0 : i64, scratch_operands = 0 : i64, tpu.core_type = #tpu.core_type<tc>, window_params = [{transform_indices = @transform_0, window_bounds = array<i64: 64, 288>}, {pipeline_mode = #tpu.pipeline_mode<synchronous>, transform_indices = @transform_1, window_bounds = array<i64: 288, 128>}, {pipeline_mode = #tpu.pipeline_mode<synchronous>, transform_indices = @transform_2, window_bounds = array<i64: 3, 128>}, {transform_indices = @transform_3, window_bounds = array<i64: 64, 128>}]} {
    %c0 = arith.constant 0 : index
    %c0_0 = arith.constant 0 : index
    %0 = vector.load %arg1[%c0, %c0_0] : memref<64x288xbf16, #tpu.memory_space<vmem>>, vector<64x288xbf16>
    %c0_1 = arith.constant 0 : index
    %c0_2 = arith.constant 0 : index
    %1 = vector.load %arg2[%c0_1, %c0_2] : memref<288x128xbf16, #tpu.memory_space<vmem>>, vector<288x128xbf16>
    %cst = arith.constant dense<0.000000e+00> : vector<64x128xf32>
    %2 = tpu.matmul %0, %1, %cst {dimension_numbers = #tpu.dot_dimension_numbers<[1], [0], [0], [1], [0, 0, 1, 1], [], []>} : vector<64x288xbf16>, vector<288x128xbf16>, vector<64x128xf32> -> vector<64x128xf32>
    %c0_3 = arith.constant 0 : index
    %c0_4 = arith.constant 0 : index
    %3 = vector.load %arg3[%c0_3, %c0_4] : memref<3x128xf32, #tpu.memory_space<vmem>>, vector<1x128xf32>
    %4 = vector.broadcast %3 : vector<1x128xf32> to vector<64x128xf32>
    %5 = arith.addf %2, %4 : vector<64x128xf32>
    %cst_5 = arith.constant 0.000000e+00 : f32
    %6 = vector.broadcast %cst_5 : f32 to vector<64x128xf32>
    %7 = arith.cmpf oge, %5, %6 : vector<64x128xf32>
    %cst_6 = arith.constant 2.000000e-01 : f32
    %8 = vector.broadcast %cst_6 : f32 to vector<64x128xf32>
    %9 = arith.mulf %8, %5 : vector<64x128xf32>
    %10 = arith.select %7, %5, %9 : vector<64x128xi1>, vector<64x128xf32>
    %c1 = arith.constant 1 : index
    %c0_7 = arith.constant 0 : index
    %11 = vector.load %arg3[%c1, %c0_7] : memref<3x128xf32, #tpu.memory_space<vmem>>, vector<1x128xf32>
    %12 = vector.broadcast %11 : vector<1x128xf32> to vector<64x128xf32>
    %13 = arith.mulf %10, %12 : vector<64x128xf32>
    %c2 = arith.constant 2 : index
    %c0_8 = arith.constant 0 : index
    %14 = vector.load %arg3[%c2, %c0_8] : memref<3x128xf32, #tpu.memory_space<vmem>>, vector<1x128xf32>
    %15 = vector.broadcast %14 : vector<1x128xf32> to vector<64x128xf32>
    %16 = arith.addf %13, %15 : vector<64x128xf32>
    %c0_9 = arith.constant 0 : index
    %c0_10 = arith.constant 0 : index
    %17 = vector.load %arg4[%c0_9, %c0_10] : memref<64x128xf32, #tpu.memory_space<vmem>>, vector<64x128xf32>
    tpu.vector_store %arg4[%c0_9, %c0_10], %16 {strides = array<i32>} : memref<64x128xf32, #tpu.memory_space<vmem>>, vector<64x128xf32>,
    return
  }
  func.func @transform_0(%arg0: i32) -> (i32, i32) {
    %c0_i32 = arith.constant 0 : i32
    %c0_i32_0 = arith.constant 0 : i32
    return %arg0, %c0_i32 : i32, i32
  }
  func.func @transform_1(%arg0: i32) -> (i32, i32) {
    %c0_i32 = arith.constant 0 : i32
    %c0_i32_0 = arith.constant 0 : i32
    %c0_i32_1 = arith.constant 0 : i32
    return %c0_i32, %c0_i32_0 : i32, i32
  }
  func.func @transform_2(%arg0: i32) -> (i32, i32) {
    %c0_i32 = arith.constant 0 : i32
    %c0_i32_0 = arith.constant 0 : i32
    %c0_i32_1 = arith.constant 0 : i32
    return %c0_i32, %c0_i32_0 : i32, i32
  }
  func.func @transform_3(%arg0: i32) -> (i32, i32) {
    %c0_i32 = arith.constant 0 : i32
    %c0_i32_0 = arith.constant 0 : i32
    return %arg0, %c0_i32 : i32, i32
  }
}

module attributes {stable_mosaic.version = 11 : i64} {
  func.func @_conv_block_kernel(%arg0: i32, %arg1: memref<16x576xbf16, #tpu.memory_space<vmem>>, %arg2: memref<576x128xbf16, #tpu.memory_space<vmem>>, %arg3: memref<3x128xf32, #tpu.memory_space<vmem>>, %arg4: memref<16x128xf32, #tpu.memory_space<vmem>>) attributes {dimension_semantics = [#tpu.dimension_semantics<parallel>], iteration_bounds = array<i64: 1>, scalar_prefetch = 0 : i64, scratch_operands = 0 : i64, tpu.core_type = #tpu.core_type<tc>, window_params = [{transform_indices = @transform_0, window_bounds = array<i64: 16, 576>}, {pipeline_mode = #tpu.pipeline_mode<synchronous>, transform_indices = @transform_1, window_bounds = array<i64: 576, 128>}, {pipeline_mode = #tpu.pipeline_mode<synchronous>, transform_indices = @transform_2, window_bounds = array<i64: 3, 128>}, {transform_indices = @transform_3, window_bounds = array<i64: 16, 128>}]} {
    %c0 = arith.constant 0 : index
    %c0_0 = arith.constant 0 : index
    %0 = vector.load %arg1[%c0, %c0_0] : memref<16x576xbf16, #tpu.memory_space<vmem>>, vector<16x576xbf16>
    %c0_1 = arith.constant 0 : index
    %c0_2 = arith.constant 0 : index
    %1 = vector.load %arg2[%c0_1, %c0_2] : memref<576x128xbf16, #tpu.memory_space<vmem>>, vector<576x128xbf16>
    %cst = arith.constant dense<0.000000e+00> : vector<16x128xf32>
    %2 = tpu.matmul %0, %1, %cst {dimension_numbers = #tpu.dot_dimension_numbers<[1], [0], [0], [1], [0, 0, 1, 1], [], []>} : vector<16x576xbf16>, vector<576x128xbf16>, vector<16x128xf32> -> vector<16x128xf32>
    %c0_3 = arith.constant 0 : index
    %c0_4 = arith.constant 0 : index
    %3 = vector.load %arg3[%c0_3, %c0_4] : memref<3x128xf32, #tpu.memory_space<vmem>>, vector<1x128xf32>
    %4 = vector.broadcast %3 : vector<1x128xf32> to vector<16x128xf32>
    %5 = arith.addf %2, %4 : vector<16x128xf32>
    %cst_5 = arith.constant 0.000000e+00 : f32
    %6 = vector.broadcast %cst_5 : f32 to vector<16x128xf32>
    %7 = arith.cmpf oge, %5, %6 : vector<16x128xf32>
    %cst_6 = arith.constant 2.000000e-01 : f32
    %8 = vector.broadcast %cst_6 : f32 to vector<16x128xf32>
    %9 = arith.mulf %8, %5 : vector<16x128xf32>
    %10 = arith.select %7, %5, %9 : vector<16x128xi1>, vector<16x128xf32>
    %c1 = arith.constant 1 : index
    %c0_7 = arith.constant 0 : index
    %11 = vector.load %arg3[%c1, %c0_7] : memref<3x128xf32, #tpu.memory_space<vmem>>, vector<1x128xf32>
    %12 = vector.broadcast %11 : vector<1x128xf32> to vector<16x128xf32>
    %13 = arith.mulf %10, %12 : vector<16x128xf32>
    %c2 = arith.constant 2 : index
    %c0_8 = arith.constant 0 : index
    %14 = vector.load %arg3[%c2, %c0_8] : memref<3x128xf32, #tpu.memory_space<vmem>>, vector<1x128xf32>
    %15 = vector.broadcast %14 : vector<1x128xf32> to vector<16x128xf32>
    %16 = arith.addf %13, %15 : vector<16x128xf32>
    %c0_9 = arith.constant 0 : index
    %c0_10 = arith.constant 0 : index
    %17 = vector.load %arg4[%c0_9, %c0_10] : memref<16x128xf32, #tpu.memory_space<vmem>>, vector<16x128xf32>
    tpu.vector_store %arg4[%c0_9, %c0_10], %16 {strides = array<i32>} : memref<16x128xf32, #tpu.memory_space<vmem>>, vector<16x128xf32>,
    return
  }
  func.func @transform_0(%arg0: i32) -> (i32, i32) {
    %c0_i32 = arith.constant 0 : i32
    %c0_i32_0 = arith.constant 0 : i32
    return %arg0, %c0_i32 : i32, i32
  }
  func.func @transform_1(%arg0: i32) -> (i32, i32) {
    %c0_i32 = arith.constant 0 : i32
    %c0_i32_0 = arith.constant 0 : i32
    %c0_i32_1 = arith.constant 0 : i32
    return %c0_i32, %c0_i32_0 : i32, i32
  }
  func.func @transform_2(%arg0: i32) -> (i32, i32) {
    %c0_i32 = arith.constant 0 : i32
    %c0_i32_0 = arith.constant 0 : i32
    %c0_i32_1 = arith.constant 0 : i32
    return %c0_i32, %c0_i32_0 : i32, i32
  }
  func.func @transform_3(%arg0: i32) -> (i32, i32) {
    %c0_i32 = arith.constant 0 : i32
    %c0_i32_0 = arith.constant 0 : i32
    return %arg0, %c0_i32 : i32, i32
  }
}

module attributes {stable_mosaic.version = 11 : i64} {
  func.func @_linear_sigmoid_kernel(%arg0: i32, %arg1: memref<4x512xbf16, #tpu.memory_space<vmem>>, %arg2: memref<512x1xbf16, #tpu.memory_space<vmem>>, %arg3: memref<1x1xf32, #tpu.memory_space<vmem>>, %arg4: memref<4x1xf32, #tpu.memory_space<vmem>>) attributes {dimension_semantics = [#tpu.dimension_semantics<arbitrary>], iteration_bounds = array<i64: 1>, scalar_prefetch = 0 : i64, scratch_operands = 0 : i64, tpu.core_type = #tpu.core_type<tc>, window_params = [{pipeline_mode = #tpu.pipeline_mode<synchronous>, transform_indices = @transform_0, window_bounds = array<i64: 4, 512>}, {pipeline_mode = #tpu.pipeline_mode<synchronous>, transform_indices = @transform_1, window_bounds = array<i64: 512, 1>}, {pipeline_mode = #tpu.pipeline_mode<synchronous>, transform_indices = @transform_2, window_bounds = array<i64: 1, 1>}, {pipeline_mode = #tpu.pipeline_mode<synchronous>, transform_indices = @transform_3, window_bounds = array<i64: 4, 1>}]} {
    %c0 = arith.constant 0 : index
    %c0_0 = arith.constant 0 : index
    %0 = vector.load %arg1[%c0, %c0_0] : memref<4x512xbf16, #tpu.memory_space<vmem>>, vector<4x512xbf16>
    %c0_1 = arith.constant 0 : index
    %c0_2 = arith.constant 0 : index
    %1 = vector.load %arg2[%c0_1, %c0_2] : memref<512x1xbf16, #tpu.memory_space<vmem>>, vector<512x1xbf16>
    %cst = arith.constant dense<0.000000e+00> : vector<4x1xf32>
    %2 = tpu.matmul %0, %1, %cst {dimension_numbers = #tpu.dot_dimension_numbers<[1], [0], [0], [1], [0, 0, 1, 1], [], []>} : vector<4x512xbf16>, vector<512x1xbf16>, vector<4x1xf32> -> vector<4x1xf32>
    %c0_3 = arith.constant 0 : index
    %c0_4 = arith.constant 0 : index
    %3 = vector.load %arg3[%c0_3, %c0_4] : memref<1x1xf32, #tpu.memory_space<vmem>>, vector<1x1xf32>
    %4 = vector.broadcast %3 : vector<1x1xf32> to vector<4x1xf32>
    %5 = arith.addf %2, %4 : vector<4x1xf32>
    %cst_5 = arith.constant 0.000000e+00 : f32
    %6 = vector.broadcast %cst_5 : f32 to vector<4x1xf32>
    %7 = arith.subf %6, %5 : vector<4x1xf32>
    %8 = math.exp %7 : vector<4x1xf32>
    %cst_6 = arith.constant 1.000000e+00 : f32
    %9 = vector.broadcast %cst_6 : f32 to vector<4x1xf32>
    %10 = arith.addf %9, %8 : vector<4x1xf32>
    %cst_7 = arith.constant 1.000000e+00 : f32
    %11 = vector.broadcast %cst_7 : f32 to vector<4x1xf32>
    %12 = arith.divf %11, %10 : vector<4x1xf32>
    %c0_8 = arith.constant 0 : index
    %c0_9 = arith.constant 0 : index
    %13 = vector.load %arg4[%c0_8, %c0_9] : memref<4x1xf32, #tpu.memory_space<vmem>>, vector<4x1xf32>
    tpu.vector_store %arg4[%c0_8, %c0_9], %12 {strides = array<i32>} : memref<4x1xf32, #tpu.memory_space<vmem>>, vector<4x1xf32>,
    return
  }
  func.func @transform_0(%arg0: i32) -> (i32, i32) {
    %c0_i32 = arith.constant 0 : i32
    %c0_i32_0 = arith.constant 0 : i32
    %c0_i32_1 = arith.constant 0 : i32
    return %c0_i32, %c0_i32_0 : i32, i32
  }
  func.func @transform_1(%arg0: i32) -> (i32, i32) {
    %c0_i32 = arith.constant 0 : i32
    %c0_i32_0 = arith.constant 0 : i32
    %c0_i32_1 = arith.constant 0 : i32
    return %c0_i32, %c0_i32_0 : i32, i32
  }
  func.func @transform_2(%arg0: i32) -> (i32, i32) {
    %c0_i32 = arith.constant 0 : i32
    %c0_i32_0 = arith.constant 0 : i32
    %c0_i32_1 = arith.constant 0 : i32
    return %c0_i32, %c0_i32_0 : i32, i32
  }
  func.func @transform_3(%arg0: i32) -> (i32, i32) {
    %c0_i32 = arith.constant 0 : i32
    %c0_i32_0 = arith.constant 0 : i32
    %c0_i32_1 = arith.constant 0 : i32
    return %c0_i32, %c0_i32_0 : i32, i32
  }
}

</mosaic_0001>

<bundles_post_ra>
// kernel: discriminator_forward.5
= control target key start
LH: loop header
LB: loop body
LE: loop exit
PB: predicated region body
PF: predicated region fallthrough
CT: control target
= control target key end

     0   :  { %s1505_s12 = smov 0   ;;  %s2003_s0 = inlined_call_operand.vmem [shape: bf16[1024,9], index: 0, kind: input, shape index: {}]   ;;  %s2004_s1 = inlined_call_operand.vmem [shape: bf16[9,128], index: 1, kind: input, shape index: {}]   ;;  %s2005_s2 = inlined_call_operand.vmem [shape: f32[3,128], index: 2, kind: input, shape index: {}]   ;;  %s2006_s3 = inlined_call_operand.vmem [shape: f32[1024,128], index: 3, kind: output, shape index: {}]  }
   0x1 LB: > { %s1254_s13 = sadd.s32 4294967295, %s1482_s12   ;;  %p1258_p0 = scmp.ge.s32.totalorder %s1482_s12, 1  ;;  %s1482_s12 = sphi %s1505_s12, %s13_s12  }
   0x2   : > { %p138_p1 = scmp.lt.s32.totalorder %s1482_s12, 3 }
   0x4   : > { %p139_p2 = pnand %p1258_p0, %p138_p1 }
   0x5   : > { %v1443_v0 = vld [vmem:[%s2004_s1] sm:$0x1f] (!%p139_p2)   ;;  %vm508_vm0 = vcmask (!%p139_p2), 1043456   ;;  %vm509_vm1 = vcmask (!%p139_p2), 1044480   ;;  %s1259_s16 = sshll.u32 (!%p139_p2), %s1254_s13, 6  ;;  %v1484_v1 = vmov (!%p139_p2), 65535  }
   0x6   : > { %142 = sbr.rel (%p139_p2) target bundleno = 332 (0x14c), region = 32  ;;  %v510_v2 = vsel (!%p139_p2), %vm508_vm0, 4294967295, %v1484_v1  ;;  %p163_p3 = scmp.lt.s32.totalorder (!%p139_p2), %s1259_s16, 127  ;;  %vm411_vm2 = vcmask (!%p139_p2), 72704   ;;  %v1591_v37 = vld [vmem:[%s2005_s2] ss:$0 sm:$0xff] (!%p139_p2) }
   0x7   : > { %v511_v3 = vsel (!%p139_p2), %vm509_vm1, %v510_v2, 0  ;;  %v1597_v42 = vld [vmem:[%s2005_s2 + $0x1] ss:$0 sm:$0xff] (!%p139_p2)  ;;  %v1605_v48 = vld [vmem:[%s2005_s2 + $0x2] ss:$0 sm:$0xff] (!%p139_p2) }
   0x8   : > { %v513_v4 = vand.u32 (!%p139_p2), %v1443_v0, %v511_v3 }
   0xa   : > { %1366 = vmatprep.subr.bf16.mxu0 (!%p139_p2), %v513_v4  ;;  %1432 = vmatprep.subr.bf16.mxu1 (!%p139_p2), %v513_v4 }
   0xb   : > { %1367 = vmatpush3.bf16.msra.mxu0 (!%p139_p2), %v513_v4  ;;  %1433 = vmatpush3.bf16.msra.mxu1 (!%p139_p2), %v513_v4 }
   0xd   : > { %s2008_s16 = smov (!%p163_p3, %s1259_s16), 127 }
   0xe   : > { %s1260_s17 = sshll.u32 %s2008_s16, 2  ;;  %s1262_s25 = sshll.u32 %s2008_s16, 3 }
   0xf   : > { %s1522_s20 = scalar_lea.vmem %s2003_s0, %s1260_s17  ;;  %s1613_s30 = scalar_lea.vmem %s2006_s3, %s1262_s25 }
  0x10   : > { %v1444_v5 = vld [vmem:[%s1522_s20] sm:$0xff]   ;;  %v1446_v7 = vld [vmem:[%s1522_s20 + $0x8] sm:$0xff]   ;;  %v1448_v9 = vld [vmem:[%s1522_s20 + $0x10] sm:$0xff]  }
  0x11   : > { %v1445_v6 = vld [vmem:[%s1522_s20 + $0x80] sm:$0xff]   ;;  %1368 = vmatprep.mubr.msk.bf16.mxu0 %vm411_vm2, %v1444_v5  ;;  %v1447_v8 = vld [vmem:[%s1522_s20 + $0x88] sm:$0xff]   ;;  %v1449_v10 = vld [vmem:[%s1522_s20 + $0x90] sm:$0xff]  }
  0x12   : > { %1400 = vmatprep.mubr.msk.bf16.mxu1 %vm411_vm2, %v1445_v6  ;;  %1369 = vmatmul.mubr.msk.bf16.vlgmr.msra.gmra.mrb[0].mxu0 %vm411_vm2, %v1446_v7  ;;  %v1450_v11 = vld [vmem:[%s1522_s20 + $0x18] sm:$0xff]   ;;  %v1452_v13 = vld [vmem:[%s1522_s20 + $0x20] sm:$0xff]   ;;  %v1454_v15 = vld [vmem:[%s1522_s20 + $0x28] sm:$0xff]  }
  0x13   : > { %1401 = vmatmul.mubr.msk.bf16.vlgmr.msra.gmra.mrb[0].mxu1 %vm411_vm2, %v1447_v8  ;;  %1372 = vmatprep.mubr.msk.bf16.mxu0 %vm411_vm2, %v1448_v9  ;;  %v1451_v12 = vld [vmem:[%s1522_s20 + $0x98] sm:$0xff]   ;;  %v1453_v14 = vld [vmem:[%s1522_s20 + $0xa0] sm:$0xff]   ;;  %v1455_v16 = vld [vmem:[%s1522_s20 + $0xa8] sm:$0xff]  }
  0x14   : > { %1404 = vmatprep.mubr.msk.bf16.mxu1 %vm411_vm2, %v1449_v10  ;;  %v1456_v17 = vld [vmem:[%s1522_s20 + $0x30] sm:$0xff]   ;;  %v1458_v19 = vld [vmem:[%s1522_s20 + $0x38] sm:$0xff]   ;;  %v1460_v21 = vld [vmem:[%s1522_s20 + $0x40] sm:$0xff]  }
  0x15   : > { %v1457_v18 = vld [vmem:[%s1522_s20 + $0xb0] sm:$0xff]   ;;  %v1459_v20 = vld [vmem:[%s1522_s20 + $0xb8] sm:$0xff]   ;;  %v1461_v22 = vld [vmem:[%s1522_s20 + $0xc0] sm:$0xff]  }
  0x16   : > { %v1462_v23 = vld [vmem:[%s1522_s20 + $0x48] sm:$0xff]   ;;  %v1464_v25 = vld [vmem:[%s1522_s20 + $0x50] sm:$0xff]   ;;  %v1466_v27 = vld [vmem:[%s1522_s20 + $0x58] sm:$0xff]  }
  0x17   : > { %v1463_v24 = vld [vmem:[%s1522_s20 + $0xc8] sm:$0xff]   ;;  %v1465_v26 = vld [vmem:[%s1522_s20 + $0xd0] sm:$0xff]   ;;  %v1467_v28 = vld [vmem:[%s1522_s20 + $0xd8] sm:$0xff]  }
  0x18   : > { %v1468_v29 = vld [vmem:[%s1522_s20 + $0x60] sm:$0xff]   ;;  %v1470_v31 = vld [vmem:[%s1522_s20 + $0x68] sm:$0xff]   ;;  %v1472_v33 = vld [vmem:[%s1522_s20 + $0x70] sm:$0xff]  }
  0x19   : > { %v1469_v30 = vld [vmem:[%s1522_s20 + $0xe0] sm:$0xff]   ;;  %v1471_v32 = vld [vmem:[%s1522_s20 + $0xe8] sm:$0xff]   ;;  %v1473_v34 = vld [vmem:[%s1522_s20 + $0xf0] sm:$0xff]  }
  0x1a   : > { %1373 = vmatmul.mubr.msk.bf16.gmra.mrb[4].mxu0 %vm411_vm2, %v1450_v11  ;;  %v1474_v35 = vld [vmem:[%s1522_s20 + $0x78] sm:$0xff]  }
  0x1b   : > { %1405 = vmatmul.mubr.msk.bf16.gmra.mrb[4].mxu1 %vm411_vm2, %v1451_v12  ;;  %1376 = vmatprep.mubr.msk.bf16.mxu0 %vm411_vm2, %v1452_v13  ;;  %v1475_v36 = vld [vmem:[%s1522_s20 + $0xf8] sm:$0xff]  }
  0x1c   : > { %1408 = vmatprep.mubr.msk.bf16.mxu1 %vm411_vm2, %v1453_v14 }
  0x22   : > { %1377 = vmatmul.mubr.msk.bf16.gmra.mrb[8].mxu0 %vm411_vm2, %v1454_v15 }
  0x23   : > { %1409 = vmatmul.mubr.msk.bf16.gmra.mrb[8].mxu1 %vm411_vm2, %v1455_v16  ;;  %1380 = vmatprep.mubr.msk.bf16.mxu0 %vm411_vm2, %v1456_v17 }
  0x24   : > { %1412 = vmatprep.mubr.msk.bf16.mxu1 %vm411_vm2, %v1457_v18 }
  0x2a   : > { %1381 = vmatmul.mubr.msk.bf16.gmra.mrb[12].mxu0 %vm411_vm2, %v1458_v19 }
  0x2b   : > { %1413 = vmatmul.mubr.msk.bf16.gmra.mrb[12].mxu1 %vm411_vm2, %v1459_v20  ;;  %1384 = vmatprep.mubr.msk.bf16.mxu0 %vm411_vm2, %v1460_v21 }
  0x2c   : > { %1416 = vmatprep.mubr.msk.bf16.mxu1 %vm411_vm2, %v1461_v22 }
  0x32   : > { %1385 = vmatmul.mubr.msk.bf16.gmra.mrb[16].mxu0 %vm411_vm2, %v1462_v23 }
  0x33   : > { %1417 = vmatmul.mubr.msk.bf16.gmra.mrb[16].mxu1 %vm411_vm2, %v1463_v24  ;;  %1388 = vmatprep.mubr.msk.bf16.mxu0 %vm411_vm2, %v1464_v25 }
  0x34   : > { %1420 = vmatprep.mubr.msk.bf16.mxu1 %vm411_vm2, %v1465_v26 }
  0x3a   : > { %1389 = vmatmul.mubr.msk.bf16.gmra.mrb[20].mxu0 %vm411_vm2, %v1466_v27 }
  0x3b   : > { %1421 = vmatmul.mubr.msk.bf16.gmra.mrb[20].mxu1 %vm411_vm2, %v1467_v28  ;;  %1392 = vmatprep.mubr.msk.bf16.mxu0 %vm411_vm2, %v1468_v29 }
  0x3c   : > { %1424 = vmatprep.mubr.msk.bf16.mxu1 %vm411_vm2, %v1469_v30 }
  0x42   : > { %1393 = vmatmul.mubr.msk.bf16.gmra.mrb[24].mxu0 %vm411_vm2, %v1470_v31 }
  0x43   : > { %1425 = vmatmul.mubr.msk.bf16.gmra.mrb[24].mxu1 %vm411_vm2, %v1471_v32  ;;  %1396 = vmatprep.mubr.msk.bf16.mxu0 %vm411_vm2, %v1472_v33 }
  0x44   : > { %1428 = vmatprep.mubr.msk.bf16.mxu1 %vm411_vm2, %v1473_v34 }
  0x4a   : > { %1397 = vmatmul.mubr.msk.bf16.gmra.mrb[28].mxu0 %vm411_vm2, %v1474_v35 }
  0x4b   : > { %1429 = vmatmul.mubr.msk.bf16.gmra.mrb[28].mxu1 %vm411_vm2, %v1475_v36 }
  0xe5   : > { %v1370_v38 = vpop.f32.mrb[0].mxu0 }
  0xe6   : > { %v558_v39 = vadd.f32 %v1370_v38, %v1591_v37  ;;  %v1402_v40 = vpop.f32.mrb[0].mxu1  ;;  %v549_v41 = vpop.f32.mrb[1].mxu0 }
  0xe7   : > { %v686_v43 = vadd.f32 %v1402_v40, %v1591_v37  ;;  %v550_v44 = vadd.f32 %v1591_v37, %v549_v41  ;;  %v677_v45 = vpop.f32.mrb[1].mxu1  ;;  %v1371_v46 = vpop.f32.mrb[2].mxu0 }
  0xe8   : > { %vm806_vm3 = vcmp.ge.f32.partialorder %v558_v39, 0.0  ;;  %v870_v47 = vmul.f32 0.2, %v558_v39  ;;  %v678_v49 = vadd.f32 %v1591_v37, %v677_v45  ;;  %v561_v50 = vadd.f32 %v1371_v46, %v1591_v37  ;;  %v1403_v51 = vpop.f32.mrb[2].mxu1  ;;  %v552_v52 = vpop.f32.mrb[3].mxu0 }
  0xe9   : > { %vm838_vm4 = vcmp.ge.f32.partialorder %v686_v43, 0.0  ;;  %v902_v53 = vmul.f32 0.2, %v686_v43  ;;  %vm804_vm5 = vcmp.ge.f32.partialorder %v550_v44, 0.0  ;;  %v868_v54 = vmul.f32 0.2, %v550_v44 }
  0xea   : > { %v934_v55 = vsel %vm806_vm3, %v558_v39, %v870_v47  ;;  %vm836_vm6 = vcmp.ge.f32.partialorder %v678_v49, 0.0  ;;  %v900_v56 = vmul.f32 0.2, %v678_v49  ;;  %vm807_vm7 = vcmp.ge.f32.partialorder %v561_v50, 0.0  ;;  %v680_v57 = vpop.f32.mrb[3].mxu1 }
  0xeb   : > { %v1003_v58 = vmul.f32 %v1597_v42, %v934_v55  ;;  %v966_v59 = vsel %vm838_vm4, %v686_v43, %v902_v53  ;;  %v932_v60 = vsel %vm804_vm5, %v550_v44, %v868_v54  ;;  %v871_v61 = vmul.f32 0.2, %v561_v50 }
  0xec   : > { %v1035_v62 = vmul.f32 %v1597_v42, %v966_v59  ;;  %v1001_v63 = vmul.f32 %v1597_v42, %v932_v60  ;;  %v964_v0 = vsel %vm836_vm6, %v678_v49, %v900_v56  ;;  %v689_v1 = vadd.f32 %v1403_v51, %v1591_v37 }
  0xed   : > { %v1072_v2 = vadd.f32 %v1605_v48, %v1003_v58  ;;  %v1033_v3 = vmul.f32 %v1597_v42, %v964_v0  ;;  %v935_v4 = vsel %vm807_vm7, %v561_v50, %v871_v61  ;;  %v553_v5 = vadd.f32 %v1591_v37, %v552_v52  ;;  %v1374_v6 = vpop.f32.mrb[4].mxu0 }
  0xee   : > { %v1104_v7 = vadd.f32 %v1605_v48, %v1035_v62  ;;  %v1070_v8 = vadd.f32 %v1605_v48, %v1001_v63  ;;  %v1004_v9 = vmul.f32 %v1597_v42, %v935_v4  ;;  %vm839_vm8 = vcmp.ge.f32.partialorder %v689_v1, 0.0  ;;  %v1406_v10 = vpop.f32.mrb[4].mxu1  ;;  %v565_v11 = vpop.f32.mrb[5].mxu0 }
  0xef   : > { %1136 = vst [vmem:[%s1613_s30 + $0x10] sm:$0xff] %v1072_v2  ;;  %v1102_v12 = vadd.f32 %v1605_v48, %v1033_v3  ;;  %v903_v13 = vmul.f32 0.2, %v689_v1  ;;  %vm805_vm9 = vcmp.ge.f32.partialorder %v553_v5, 0.0  ;;  %v869_v14 = vmul.f32 0.2, %v553_v5 }
  0xf0   : > { %v693_v15 = vpop.f32.mrb[5].mxu1  ;;  %1168 = vst [vmem:[%s1613_s30 + $0x110] sm:$0xff] %v1104_v7  ;;  %1134 = vst [vmem:[%s1613_s30] sm:$0xff] %v1070_v8  ;;  %v1073_v16 = vadd.f32 %v1605_v48, %v1004_v9  ;;  %v681_v17 = vadd.f32 %v1591_v37, %v680_v57  ;;  %v574_v18 = vadd.f32 %v1374_v6, %v1591_v37  ;;  %v1375_v20 = vpop.f32.mrb[6].mxu0 }
  0xf1   : > { %v702_v19 = vadd.f32 %v1406_v10, %v1591_v37  ;;  %v1407_v21 = vpop.f32.mrb[6].mxu1  ;;  %1166 = vst [vmem:[%s1613_s30 + $0x100] sm:$0xff] %v1102_v12  ;;  %v967_v22 = vsel %vm839_vm8, %v689_v1, %v903_v13  ;;  %v933_v23 = vsel %vm805_vm9, %v553_v5, %v869_v14  ;;  %v566_v24 = vadd.f32 %v1591_v37, %v565_v11  ;;  %v568_v26 = vpop.f32.mrb[7].mxu0 }
  0xf2   : > { %v694_v25 = vadd.f32 %v1591_v37, %v693_v15  ;;  %v696_v27 = vpop.f32.mrb[7].mxu1  ;;  %1137 = vst [vmem:[%s1613_s30 + $0x18] sm:$0xff] %v1073_v16  ;;  %v1036_v28 = vmul.f32 %v1597_v42, %v967_v22  ;;  %v1002_v29 = vmul.f32 %v1597_v42, %v933_v23  ;;  %vm837_vm10 = vcmp.ge.f32.partialorder %v681_v17, 0.0 }
  0xf3   : > { %v901_v30 = vmul.f32 0.2, %v681_v17  ;;  %vm810_vm11 = vcmp.ge.f32.partialorder %v574_v18, 0.0  ;;  %v874_v31 = vmul.f32 0.2, %v574_v18  ;;  %vm842_vm12 = vcmp.ge.f32.partialorder %v702_v19, 0.0 }
  0xf4   : > { %v906_v32 = vmul.f32 0.2, %v702_v19  ;;  %v1105_v33 = vadd.f32 %v1605_v48, %v1036_v28  ;;  %v1071_v34 = vadd.f32 %v1605_v48, %v1002_v29  ;;  %vm808_vm13 = vcmp.ge.f32.partialorder %v566_v24, 0.0 }
  0xf5   : > { %v965_v35 = vsel %vm837_vm10, %v681_v17, %v901_v30  ;;  %v938_v38 = vsel %vm810_vm11, %v574_v18, %v874_v31  ;;  %v872_v40 = vmul.f32 0.2, %v566_v24  ;;  %v1378_v41 = vpop.f32.mrb[8].mxu0  ;;  %vm840_vm14 = vcmp.ge.f32.partialorder %v694_v25, 0.0 }
  0xf6   : > { %v1034_v36 = vmul.f32 %v1597_v42, %v965_v35  ;;  %v970_v39 = vsel %vm842_vm12, %v702_v19, %v906_v32  ;;  %1169 = vst [vmem:[%s1613_s30 + $0x118] sm:$0xff] %v1105_v33  ;;  %1135 = vst [vmem:[%s1613_s30 + $0x8] sm:$0xff] %v1071_v34  ;;  %v1007_v43 = vmul.f32 %v1597_v42, %v938_v38  ;;  %v904_v45 = vmul.f32 0.2, %v694_v25  ;;  %v1410_v46 = vpop.f32.mrb[8].mxu1  ;;  %v581_v47 = vpop.f32.mrb[9].mxu0 }
  0xf7   : > { %v1039_v44 = vmul.f32 %v1597_v42, %v970_v39  ;;  %v936_v50 = vsel %vm808_vm13, %v566_v24, %v872_v40  ;;  %v577_v51 = vadd.f32 %v1375_v20, %v1591_v37  ;;  %v705_v52 = vadd.f32 %v1407_v21, %v1591_v37  ;;  %v709_v53 = vpop.f32.mrb[9].mxu1  ;;  %v1379_v54 = vpop.f32.mrb[10].mxu0 }
  0xf8   : > { %v1103_v49 = vadd.f32 %v1605_v48, %v1034_v36  ;;  %v1076_v55 = vadd.f32 %v1605_v48, %v1007_v43  ;;  %v1005_v57 = vmul.f32 %v1597_v42, %v936_v50  ;;  %v968_v58 = vsel %vm840_vm14, %v694_v25, %v904_v45  ;;  %v1652_v59 = vpop.f32.mrb[10].mxu1  ;;  %v1654_v60 = vpop.f32.mrb[11].mxu0 }
  0xf9   : > { %v1108_v56 = vadd.f32 %v1605_v48, %v1039_v44  ;;  %v1037_v61 = vmul.f32 %v1597_v42, %v968_v58  ;;  %vm811_vm15 = vcmp.ge.f32.partialorder %v577_v51, 0.0  ;;  %v875_v62 = vmul.f32 0.2, %v577_v51  ;;  %v1658_v63 = vpop.f32.mrb[11].mxu1 }
  0xfa   : > { %1167 = vst [vmem:[%s1613_s30 + $0x108] sm:$0xff] %v1103_v49  ;;  %vm843_vm0 = vcmp.ge.f32.partialorder %v705_v52, 0.0  ;;  %1140 = vst [vmem:[%s1613_s30 + $0x30] sm:$0xff] %v1076_v55  ;;  %v1074_v0 = vadd.f32 %v1605_v48, %v1005_v57  ;;  %v907_v1 = vmul.f32 0.2, %v705_v52  ;;  %v569_v2 = vadd.f32 %v1591_v37, %v568_v26 }
  0xfb   : > { %1172 = vst [vmem:[%s1613_s30 + $0x130] sm:$0xff] %v1108_v56  ;;  %v697_v3 = vadd.f32 %v1591_v37, %v696_v27  ;;  %v1106_v4 = vadd.f32 %v1605_v48, %v1037_v61  ;;  %v939_v5 = vsel %vm811_vm15, %v577_v51, %v875_v62  ;;  %v590_v6 = vadd.f32 %v1378_v41, %v1591_v37 }
  0xfc   : > { %v718_v7 = vadd.f32 %v1410_v46, %v1591_v37  ;;  %1138 = vst [vmem:[%s1613_s30 + $0x20] sm:$0xff] %v1074_v0  ;;  %v1008_v8 = vmul.f32 %v1597_v42, %v939_v5  ;;  %v971_v9 = vsel %vm843_vm0, %v705_v52, %v907_v1  ;;  %vm809_vm1 = vcmp.ge.f32.partialorder %v569_v2, 0.0 }
  0xfd   : > { %v873_v10 = vmul.f32 0.2, %v569_v2  ;;  %1170 = vst [vmem:[%s1613_s30 + $0x120] sm:$0xff] %v1106_v4  ;;  %v1040_v11 = vmul.f32 %v1597_v42, %v971_v9  ;;  %vm841_vm2 = vcmp.ge.f32.partialorder %v697_v3, 0.0  ;;  %v905_v12 = vmul.f32 0.2, %v697_v3 }
  0xfe   : > { %vm814_vm3 = vcmp.ge.f32.partialorder %v590_v6, 0.0  ;;  %v1672_v13 = vpop.f32.mrb[12].mxu0  ;;  %v1077_v14 = vadd.f32 %v1605_v48, %v1008_v8  ;;  %v878_v16 = vmul.f32 0.2, %v590_v6  ;;  %vm846_vm4 = vcmp.ge.f32.partialorder %v718_v7, 0.0  ;;  %v1675_v17 = vpop.f32.mrb[12].mxu1 }
  0xff   : > { %v937_v15 = vsel %vm809_vm1, %v569_v2, %v873_v10  ;;  %v1677_v18 = vpop.f32.mrb[13].mxu0  ;;  %v1109_v19 = vadd.f32 %v1605_v48, %v1040_v11  ;;  %v969_v21 = vsel %vm841_vm2, %v697_v3, %v905_v12  ;;  %v910_v22 = vmul.f32 0.2, %v718_v7  ;;  %v1681_v23 = vpop.f32.mrb[13].mxu1 }
 0x100   : > { %v1006_v20 = vmul.f32 %v1597_v42, %v937_v15  ;;  %v1683_v24 = vpop.f32.mrb[14].mxu0  ;;  %1141 = vst [vmem:[%s1613_s30 + $0x38] sm:$0xff] %v1077_v14  ;;  %v1038_v25 = vmul.f32 %v1597_v42, %v969_v21  ;;  %v942_v26 = vsel %vm814_vm3, %v590_v6, %v878_v16  ;;  %v582_v27 = vadd.f32 %v1591_v37, %v581_v47  ;;  %v1690_v29 = vpop.f32.mrb[14].mxu1 }
 0x101   : > { %v710_v28 = vadd.f32 %v1591_v37, %v709_v53  ;;  %v1692_v30 = vpop.f32.mrb[15].mxu0  ;;  %1173 = vst [vmem:[%s1613_s30 + $0x138] sm:$0xff] %v1109_v19  ;;  %v1011_v32 = vmul.f32 %v1597_v42, %v942_v26  ;;  %v974_v33 = vsel %vm846_vm4, %v718_v7, %v910_v22  ;;  %v593_v34 = vadd.f32 %v1379_v54, %v1591_v37  ;;  %v1699_v35 = vpop.f32.mrb[15].mxu1 }
 0x102   : > { %v1075_v31 = vadd.f32 %v1605_v48, %v1006_v20  ;;  %v1107_v36 = vadd.f32 %v1605_v48, %v1038_v25  ;;  %v1043_v38 = vmul.f32 %v1597_v42, %v974_v33  ;;  %vm812_vm5 = vcmp.ge.f32.partialorder %v582_v27, 0.0 }
 0x103   : > { %v876_v39 = vmul.f32 0.2, %v582_v27  ;;  %v1080_v40 = vadd.f32 %v1605_v48, %v1011_v32  ;;  %vm844_vm6 = vcmp.ge.f32.partialorder %v710_v28, 0.0  ;;  %v908_v41 = vmul.f32 0.2, %v710_v28 }
 0x104   : > { %1139 = vst [vmem:[%s1613_s30 + $0x28] sm:$0xff] %v1075_v31  ;;  %vm815_vm7 = vcmp.ge.f32.partialorder %v593_v34, 0.0  ;;  %1171 = vst [vmem:[%s1613_s30 + $0x128] sm:$0xff] %v1107_v36  ;;  %v1112_v43 = vadd.f32 %v1605_v48, %v1043_v38  ;;  %v879_v45 = vmul.f32 0.2, %v593_v34  ;;  %v721_v46 = vadd.f32 %v1652_v59, %v1591_v37 }
 0x105   : > { %v940_v44 = vsel %vm812_vm5, %v582_v27, %v876_v39  ;;  %1144 = vst [vmem:[%s1613_s30 + $0x50] sm:$0xff] %v1080_v40  ;;  %v972_v49 = vsel %vm844_vm6, %v710_v28, %v908_v41  ;;  %v585_v50 = vadd.f32 %v1591_v37, %v1654_v60  ;;  %v713_v51 = vadd.f32 %v1591_v37, %v1658_v63  ;;  %v1715_v52 = vpop.f32.mrb[16].mxu0 }
 0x106   : > { %v1009_v47 = vmul.f32 %v1597_v42, %v940_v44  ;;  %1176 = vst [vmem:[%s1613_s30 + $0x150] sm:$0xff] %v1112_v43  ;;  %v1041_v53 = vmul.f32 %v1597_v42, %v972_v49  ;;  %v943_v54 = vsel %vm815_vm7, %v593_v34, %v879_v45  ;;  %vm847_vm8 = vcmp.ge.f32.partialorder %v721_v46, 0.0  ;;  %v1719_v56 = vpop.f32.mrb[16].mxu1  ;;  %v1721_v57 = vpop.f32.mrb[17].mxu0 }
 0x107   : > { %v911_v55 = vmul.f32 0.2, %v721_v46  ;;  %v1012_v59 = vmul.f32 %v1597_v42, %v943_v54  ;;  %vm813_vm9 = vcmp.ge.f32.partialorder %v585_v50, 0.0  ;;  %v877_v60 = vmul.f32 0.2, %v585_v50  ;;  %v1725_v61 = vpop.f32.mrb[17].mxu1 }
 0x108   : > { %v1078_v58 = vadd.f32 %v1605_v48, %v1009_v47  ;;  %v1727_v62 = vpop.f32.mrb[18].mxu0  ;;  %v1110_v63 = vadd.f32 %v1605_v48, %v1041_v53  ;;  %vm845_vm10 = vcmp.ge.f32.partialorder %v713_v51, 0.0  ;;  %v909_v1 = vmul.f32 0.2, %v713_v51  ;;  %v1730_v2 = vpop.f32.mrb[18].mxu1 }
 0x109   : > { %v975_v0 = vsel %vm847_vm8, %v721_v46, %v911_v55  ;;  %v1732_v3 = vpop.f32.mrb[19].mxu0  ;;  %v1081_v4 = vadd.f32 %v1605_v48, %v1012_v59  ;;  %v941_v6 = vsel %vm813_vm9, %v585_v50, %v877_v60  ;;  %v606_v7 = vadd.f32 %v1672_v13, %v1591_v37  ;;  %v1739_v8 = vpop.f32.mrb[19].mxu1 }
 0x10a   : > { %1142 = vst [vmem:[%s1613_s30 + $0x40] sm:$0xff] %v1078_v58  ;;  %v1044_v5 = vmul.f32 %v1597_v42, %v975_v0  ;;  %1174 = vst [vmem:[%s1613_s30 + $0x140] sm:$0xff] %v1110_v63  ;;  %v1010_v9 = vmul.f32 %v1597_v42, %v941_v6  ;;  %v973_v10 = vsel %vm845_vm10, %v713_v51, %v909_v1 }
 0x10b   : > { %v734_v11 = vadd.f32 %v1675_v17, %v1591_v37  ;;  %v598_v12 = vadd.f32 %v1591_v37, %v1677_v18  ;;  %1145 = vst [vmem:[%s1613_s30 + $0x58] sm:$0xff] %v1081_v4  ;;  %v1042_v15 = vmul.f32 %v1597_v42, %v973_v10  ;;  %vm818_vm11 = vcmp.ge.f32.partialorder %v606_v7, 0.0 }
 0x10c   : > { %v1113_v14 = vadd.f32 %v1605_v48, %v1044_v5  ;;  %v882_v13 = vmul.f32 0.2, %v606_v7  ;;  %v1079_v16 = vadd.f32 %v1605_v48, %v1010_v9  ;;  %v726_v18 = vadd.f32 %v1591_v37, %v1681_v23 }
 0x10d   : > { %vm850_vm12 = vcmp.ge.f32.partialorder %v734_v11, 0.0  ;;  %v914_v19 = vmul.f32 0.2, %v734_v11  ;;  %vm816_vm13 = vcmp.ge.f32.partialorder %v598_v12, 0.0  ;;  %v1111_v17 = vadd.f32 %v1605_v48, %v1042_v15  ;;  %v1755_v22 = vpop.f32.mrb[20].mxu0 }
 0x10e   : > { %1177 = vst [vmem:[%s1613_s30 + $0x158] sm:$0xff] %v1113_v14  ;;  %v946_v20 = vsel %vm818_vm11, %v606_v7, %v882_v13  ;;  %v880_v21 = vmul.f32 0.2, %v598_v12  ;;  %1143 = vst [vmem:[%s1613_s30 + $0x48] sm:$0xff] %v1079_v16  ;;  %v609_v27 = vadd.f32 %v1683_v24, %v1591_v37  ;;  %v737_v28 = vadd.f32 %v1690_v29, %v1591_v37  ;;  %v1763_v31 = vpop.f32.mrb[20].mxu1  ;;  %v1765_v32 = vpop.f32.mrb[21].mxu0 }
 0x10f   : > { %v1015_v25 = vmul.f32 %v1597_v42, %v946_v20  ;;  %v978_v26 = vsel %vm850_vm12, %v734_v11, %v914_v19  ;;  %1175 = vst [vmem:[%s1613_s30 + $0x148] sm:$0xff] %v1111_v17  ;;  %vm848_vm14 = vcmp.ge.f32.partialorder %v726_v18, 0.0  ;;  %v912_v34 = vmul.f32 0.2, %v726_v18  ;;  %v1770_v36 = vpop.f32.mrb[21].mxu1  ;;  %v1772_v38 = vpop.f32.mrb[22].mxu0 }
 0x110   : > { %v1047_v33 = vmul.f32 %v1597_v42, %v978_v26  ;;  %v944_v23 = vsel %vm816_vm13, %v598_v12, %v880_v21  ;;  %vm819_vm15 = vcmp.ge.f32.partialorder %v609_v27, 0.0  ;;  %v883_v39 = vmul.f32 0.2, %v609_v27  ;;  %v1776_v40 = vpop.f32.mrb[22].mxu1  ;;  %v1778_v41 = vpop.f32.mrb[23].mxu0 }
 0x111   : > { %v1084_v24 = vadd.f32 %v1605_v48, %v1015_v25  ;;  %v1013_v29 = vmul.f32 %v1597_v42, %v944_v23  ;;  %v976_v44 = vsel %vm848_vm14, %v726_v18, %v912_v34  ;;  %vm851_vm0 = vcmp.ge.f32.partialorder %v737_v28, 0.0  ;;  %v1781_v46 = vpop.f32.mrb[23].mxu1 }
 0x112   : > { %v1116_v43 = vadd.f32 %v1605_v48, %v1047_v33  ;;  %v915_v45 = vmul.f32 0.2, %v737_v28  ;;  %v1045_v49 = vmul.f32 %v1597_v42, %v976_v44  ;;  %v947_v50 = vsel %vm819_vm15, %v609_v27, %v883_v39 }
 0x113   : > { %1148 = vst [vmem:[%s1613_s30 + $0x70] sm:$0xff] %v1084_v24  ;;  %v1082_v47 = vadd.f32 %v1605_v48, %v1013_v29  ;;  %v601_v51 = vadd.f32 %v1591_v37, %v1692_v30  ;;  %v1016_v53 = vmul.f32 %v1597_v42, %v947_v50  ;;  %v729_v55 = vadd.f32 %v1591_v37, %v1699_v35 }
 0x114   : > { %1180 = vst [vmem:[%s1613_s30 + $0x170] sm:$0xff] %v1116_v43  ;;  %v979_v54 = vsel %vm851_vm0, %v737_v28, %v915_v45  ;;  %v622_v58 = vadd.f32 %v1715_v52, %v1591_v37  ;;  %v1114_v59 = vadd.f32 %v1605_v48, %v1045_v49  ;;  %v750_v5 = vadd.f32 %v1719_v56, %v1591_v37 }
 0x115   : > { %1146 = vst [vmem:[%s1613_s30 + $0x60] sm:$0xff] %v1082_v47  ;;  %v1048_v60 = vmul.f32 %v1597_v42, %v979_v54  ;;  %vm817_vm1 = vcmp.ge.f32.partialorder %v601_v51, 0.0  ;;  %v881_v63 = vmul.f32 0.2, %v601_v51  ;;  %v1085_v30 = vadd.f32 %v1605_v48, %v1016_v53  ;;  %v1798_v1 = vpop.f32.mrb[24].mxu0 }
 0x116   : > { %vm849_vm2 = vcmp.ge.f32.partialorder %v729_v55, 0.0  ;;  %v913_v0 = vmul.f32 0.2, %v729_v55  ;;  %vm822_vm3 = vcmp.ge.f32.partialorder %v622_v58, 0.0  ;;  %1178 = vst [vmem:[%s1613_s30 + $0x160] sm:$0xff] %v1114_v59  ;;  %v1804_v6 = vpop.f32.mrb[24].mxu1  ;;  %v614_v11 = vadd.f32 %v1591_v37, %v1721_v57 }
 0x117   : > { %v1117_v35 = vadd.f32 %v1605_v48, %v1048_v60  ;;  %v945_v52 = vsel %vm817_vm1, %v601_v51, %v881_v63  ;;  %v886_v4 = vmul.f32 0.2, %v622_v58  ;;  %v1806_v7 = vpop.f32.mrb[25].mxu0  ;;  %1149 = vst [vmem:[%s1613_s30 + $0x78] sm:$0xff] %v1085_v30  ;;  %v742_v12 = vadd.f32 %v1591_v37, %v1725_v61  ;;  %v1814_v14 = vpop.f32.mrb[25].mxu1 }
 0x118   : > { %v1014_v9 = vmul.f32 %v1597_v42, %v945_v52  ;;  %v977_v10 = vsel %vm849_vm2, %v729_v55, %v913_v0  ;;  %v1816_v15 = vpop.f32.mrb[26].mxu0  ;;  %vm854_vm4 = vcmp.ge.f32.partialorder %v750_v5, 0.0  ;;  %v918_v16 = vmul.f32 0.2, %v750_v5  ;;  %v1821_v19 = vpop.f32.mrb[26].mxu1 }
 0x119   : > { %1181 = vst [vmem:[%s1613_s30 + $0x178] sm:$0xff] %v1117_v35  ;;  %v1046_v56 = vmul.f32 %v1597_v42, %v977_v10  ;;  %v950_v13 = vsel %vm822_vm3, %v622_v58, %v886_v4  ;;  %v1823_v17 = vpop.f32.mrb[27].mxu0  ;;  %vm820_vm5 = vcmp.ge.f32.partialorder %v614_v11, 0.0  ;;  %v884_v20 = vmul.f32 0.2, %v614_v11  ;;  %v1827_v21 = vpop.f32.mrb[27].mxu1 }
 0x11a   : > { %v1083_v57 = vadd.f32 %v1605_v48, %v1014_v9  ;;  %v1019_v61 = vmul.f32 %v1597_v42, %v950_v13  ;;  %v982_v25 = vsel %vm854_vm4, %v750_v5, %v918_v16  ;;  %vm852_vm6 = vcmp.ge.f32.partialorder %v742_v12, 0.0 }
 0x11b   : > { %v1115_v18 = vadd.f32 %v1605_v48, %v1046_v56  ;;  %v916_v26 = vmul.f32 0.2, %v742_v12  ;;  %v1051_v28 = vmul.f32 %v1597_v42, %v982_v25  ;;  %v948_v33 = vsel %vm820_vm5, %v614_v11, %v884_v20 }
 0x11c   : > { %1147 = vst [vmem:[%s1613_s30 + $0x68] sm:$0xff] %v1083_v57  ;;  %v1088_v27 = vadd.f32 %v1605_v48, %v1019_v61  ;;  %v625_v23 = vadd.f32 %v1727_v62, %v1591_v37  ;;  %v1017_v34 = vmul.f32 %v1597_v42, %v948_v33  ;;  %v753_v29 = vadd.f32 %v1730_v2, %v1591_v37 }
 0x11d   : > { %1179 = vst [vmem:[%s1613_s30 + $0x168] sm:$0xff] %v1115_v18  ;;  %v980_v24 = vsel %vm852_vm6, %v742_v12, %v916_v26  ;;  %v617_v39 = vadd.f32 %v1591_v37, %v1732_v3  ;;  %v1120_v43 = vadd.f32 %v1605_v48, %v1051_v28  ;;  %v1844_v62 = vpop.f32.mrb[28].mxu0  ;;  %v745_v54 = vadd.f32 %v1591_v37, %v1739_v8 }
 0x11e   : > { %1152 = vst [vmem:[%s1613_s30 + $0x90] sm:$0xff] %v1088_v27  ;;  %v1049_v44 = vmul.f32 %v1597_v42, %v980_v24  ;;  %vm823_vm7 = vcmp.ge.f32.partialorder %v625_v23, 0.0  ;;  %v887_v45 = vmul.f32 0.2, %v625_v23  ;;  %v1086_v47 = vadd.f32 %v1605_v48, %v1017_v34  ;;  %v1847_v50 = vpop.f32.mrb[28].mxu1  ;;  %v1849_v2 = vpop.f32.mrb[29].mxu0 }
 0x11f   : > { %vm855_vm8 = vcmp.ge.f32.partialorder %v753_v29, 0.0  ;;  %v919_v49 = vmul.f32 0.2, %v753_v29  ;;  %vm821_vm9 = vcmp.ge.f32.partialorder %v617_v39, 0.0  ;;  %1184 = vst [vmem:[%s1613_s30 + $0x190] sm:$0xff] %v1120_v43  ;;  %v1855_v55 = vpop.f32.mrb[29].mxu1  ;;  %v638_v63 = vadd.f32 %v1755_v22, %v1591_v37 }
 0x120   : > { %v1118_v3 = vadd.f32 %v1605_v48, %v1049_v44  ;;  %v951_v51 = vsel %vm823_vm7, %v625_v23, %v887_v45  ;;  %v885_v53 = vmul.f32 0.2, %v617_v39  ;;  %v1857_v58 = vpop.f32.mrb[30].mxu0  ;;  %1150 = vst [vmem:[%s1613_s30 + $0x80] sm:$0xff] %v1086_v47  ;;  %v766_v30 = vadd.f32 %v1763_v31, %v1591_v37  ;;  %v1865_v0 = vpop.f32.mrb[30].mxu1 }
 0x121   : > { %v1020_v59 = vmul.f32 %v1597_v42, %v951_v51  ;;  %v983_v60 = vsel %vm855_vm8, %v753_v29, %v919_v49  ;;  %v1867_v35 = vpop.f32.mrb[31].mxu0  ;;  %vm853_vm10 = vcmp.ge.f32.partialorder %v745_v54, 0.0  ;;  %v917_v4 = vmul.f32 0.2, %v745_v54  ;;  %v1872_v5 = vpop.f32.mrb[31].mxu1 }
 0x122   : > { %1182 = vst [vmem:[%s1613_s30 + $0x180] sm:$0xff] %v1118_v3  ;;  %v1052_v8 = vmul.f32 %v1597_v42, %v983_v60  ;;  %v949_v52 = vsel %vm821_vm9, %v617_v39, %v885_v53  ;;  %vm826_vm11 = vcmp.ge.f32.partialorder %v638_v63, 0.0  ;;  %v890_v31 = vmul.f32 0.2, %v638_v63 }
 0x123   : > { %v1089_v22 = vadd.f32 %v1605_v48, %v1020_v59  ;;  %v1018_v9 = vmul.f32 %v1597_v42, %v949_v52  ;;  %v981_v11 = vsel %vm853_vm10, %v745_v54, %v917_v4  ;;  %vm858_vm12 = vcmp.ge.f32.partialorder %v766_v30, 0.0 }
 0x124   : > { %v1121_v10 = vadd.f32 %v1605_v48, %v1052_v8  ;;  %v922_v12 = vmul.f32 0.2, %v766_v30  ;;  %v1050_v13 = vmul.f32 %v1597_v42, %v981_v11  ;;  %v954_v16 = vsel %vm826_vm11, %v638_v63, %v890_v31 }
 0x125   : > { %1153 = vst [vmem:[%s1613_s30 + $0x98] sm:$0xff] %v1089_v22  ;;  %v1087_v56 = vadd.f32 %v1605_v48, %v1018_v9  ;;  %v630_v57 = vadd.f32 %v1591_v37, %v1765_v32  ;;  %v1023_v61 = vmul.f32 %v1597_v42, %v954_v16  ;;  %v758_v18 = vadd.f32 %v1591_v37, %v1770_v36 }
 0x126   : > { %1185 = vst [vmem:[%s1613_s30 + $0x198] sm:$0xff] %v1121_v10  ;;  %v986_v20 = vsel %vm858_vm12, %v766_v30, %v922_v12  ;;  %v641_v25 = vadd.f32 %v1772_v38, %v1591_v37  ;;  %v1119_v26 = vadd.f32 %v1605_v48, %v1050_v13  ;;  %v769_v38 = vadd.f32 %v1776_v40, %v1591_v37 }
 0x127   : > { %1151 = vst [vmem:[%s1613_s30 + $0x88] sm:$0xff] %v1087_v56  ;;  %v1055_v27 = vmul.f32 %v1597_v42, %v986_v20  ;;  %vm824_vm13 = vcmp.ge.f32.partialorder %v630_v57, 0.0  ;;  %v888_v28 = vmul.f32 0.2, %v630_v57  ;;  %v1092_v32 = vadd.f32 %v1605_v48, %v1023_v61 }
 0x128   : > { %vm856_vm14 = vcmp.ge.f32.partialorder %v758_v18, 0.0  ;;  %v920_v33 = vmul.f32 0.2, %v758_v18  ;;  %vm827_vm15 = vcmp.ge.f32.partialorder %v641_v25, 0.0  ;;  %1183 = vst [vmem:[%s1613_s30 + $0x188] sm:$0xff] %v1119_v26  ;;  %v633_v39 = vadd.f32 %v1591_v37, %v1778_v41 }
 0x129   : > { %v1124_v36 = vadd.f32 %v1605_v48, %v1055_v27  ;;  %v952_v23 = vsel %vm824_vm13, %v630_v57, %v888_v28  ;;  %v891_v34 = vmul.f32 0.2, %v641_v25  ;;  %1156 = vst [vmem:[%s1613_s30 + $0xb0] sm:$0xff] %v1092_v32  ;;  %v761_v43 = vadd.f32 %v1591_v37, %v1781_v46 }
 0x12a   : > { %v1021_v24 = vmul.f32 %v1597_v42, %v952_v23  ;;  %v984_v29 = vsel %vm856_vm14, %v758_v18, %v920_v33  ;;  %vm859_vm0 = vcmp.ge.f32.partialorder %v769_v38, 0.0  ;;  %v923_v47 = vmul.f32 0.2, %v769_v38 }
 0x12b   : > { %1188 = vst [vmem:[%s1613_s30 + $0x1b0] sm:$0xff] %v1124_v36  ;;  %v1053_v44 = vmul.f32 %v1597_v42, %v984_v29  ;;  %v955_v45 = vsel %vm827_vm15, %v641_v25, %v891_v34  ;;  %vm825_vm1 = vcmp.ge.f32.partialorder %v633_v39, 0.0  ;;  %v889_v3 = vmul.f32 0.2, %v633_v39 }
 0x12c   : > { %v1090_v40 = vadd.f32 %v1605_v48, %v1021_v24  ;;  %v1024_v49 = vmul.f32 %v1597_v42, %v955_v45  ;;  %v987_v41 = vsel %vm859_vm0, %v769_v38, %v923_v47  ;;  %vm857_vm2 = vcmp.ge.f32.partialorder %v761_v43, 0.0 }
 0x12d   : > { %v1122_v51 = vadd.f32 %v1605_v48, %v1053_v44  ;;  %v921_v53 = vmul.f32 0.2, %v761_v43  ;;  %v1056_v54 = vmul.f32 %v1597_v42, %v987_v41  ;;  %v953_v59 = vsel %vm825_vm1, %v633_v39, %v889_v3 }
 0x12e   : > { %1154 = vst [vmem:[%s1613_s30 + $0xa0] sm:$0xff] %v1090_v40  ;;  %v1093_v46 = vadd.f32 %v1605_v48, %v1024_v49  ;;  %v654_v60 = vadd.f32 %v1798_v1, %v1591_v37  ;;  %v1022_v63 = vmul.f32 %v1597_v42, %v953_v59  ;;  %v782_v8 = vadd.f32 %v1804_v6, %v1591_v37 }
 0x12f   : > { %1186 = vst [vmem:[%s1613_s30 + $0x1a0] sm:$0xff] %v1122_v51  ;;  %v985_v30 = vsel %vm857_vm2, %v761_v43, %v921_v53  ;;  %v646_v52 = vadd.f32 %v1591_v37, %v1806_v7  ;;  %v1125_v4 = vadd.f32 %v1605_v48, %v1056_v54  ;;  %v774_v7 = vadd.f32 %v1591_v37, %v1814_v14 }
 0x130   : > { %1157 = vst [vmem:[%s1613_s30 + $0xb8] sm:$0xff] %v1093_v46  ;;  %v1054_v22 = vmul.f32 %v1597_v42, %v985_v30  ;;  %vm830_vm3 = vcmp.ge.f32.partialorder %v654_v60, 0.0  ;;  %v894_v9 = vmul.f32 0.2, %v654_v60  ;;  %v1091_v1 = vadd.f32 %v1605_v48, %v1022_v63 }
 0x131   : > { %vm862_vm4 = vcmp.ge.f32.partialorder %v782_v8, 0.0  ;;  %v926_v31 = vmul.f32 0.2, %v782_v8  ;;  %vm828_vm5 = vcmp.ge.f32.partialorder %v646_v52, 0.0  ;;  %1189 = vst [vmem:[%s1613_s30 + $0x1b8] sm:$0xff] %v1125_v4  ;;  %v657_v13 = vadd.f32 %v1816_v15, %v1591_v37 }
 0x132   : > { %v1123_v6 = vadd.f32 %v1605_v48, %v1054_v22  ;;  %v958_v10 = vsel %vm830_vm3, %v654_v60, %v894_v9  ;;  %v892_v11 = vmul.f32 0.2, %v646_v52  ;;  %1155 = vst [vmem:[%s1613_s30 + $0xa8] sm:$0xff] %v1091_v1  ;;  %v785_v16 = vadd.f32 %v1821_v19, %v1591_v37 }
 0x133   : > { %v1027_v12 = vmul.f32 %v1597_v42, %v958_v10  ;;  %v990_v56 = vsel %vm862_vm4, %v782_v8, %v926_v31  ;;  %vm860_vm6 = vcmp.ge.f32.partialorder %v774_v7, 0.0  ;;  %v924_v20 = vmul.f32 0.2, %v774_v7 }
 0x134   : > { %1187 = vst [vmem:[%s1613_s30 + $0x1a8] sm:$0xff] %v1123_v6  ;;  %v1059_v57 = vmul.f32 %v1597_v42, %v990_v56  ;;  %v956_v61 = vsel %vm828_vm5, %v646_v52, %v892_v11  ;;  %vm831_vm7 = vcmp.ge.f32.partialorder %v657_v13, 0.0  ;;  %v895_v25 = vmul.f32 0.2, %v657_v13 }
 0x135   : > { %v1096_v14 = vadd.f32 %v1605_v48, %v1027_v12  ;;  %v1025_v18 = vmul.f32 %v1597_v42, %v956_v61  ;;  %v988_v15 = vsel %vm860_vm6, %v774_v7, %v924_v20  ;;  %vm863_vm8 = vcmp.ge.f32.partialorder %v785_v16, 0.0 }
 0x136   : > { %v1128_v26 = vadd.f32 %v1605_v48, %v1059_v57  ;;  %v927_v27 = vmul.f32 0.2, %v785_v16  ;;  %v1057_v28 = vmul.f32 %v1597_v42, %v988_v15  ;;  %v959_v32 = vsel %vm831_vm7, %v657_v13, %v895_v25 }
 0x137   : > { %1160 = vst [vmem:[%s1613_s30 + $0xd0] sm:$0xff] %v1096_v14  ;;  %v1094_v19 = vadd.f32 %v1605_v48, %v1025_v18  ;;  %v649_v33 = vadd.f32 %v1591_v37, %v1823_v17  ;;  %v1028_v36 = vmul.f32 %v1597_v42, %v959_v32  ;;  %v777_v34 = vadd.f32 %v1591_v37, %v1827_v21 }
 0x138   : > { %1192 = vst [vmem:[%s1613_s30 + $0x1d0] sm:$0xff] %v1128_v26  ;;  %v991_v23 = vsel %vm863_vm8, %v785_v16, %v927_v27  ;;  %v670_v38 = vadd.f32 %v1844_v62, %v1591_v37  ;;  %v1126_v24 = vadd.f32 %v1605_v48, %v1057_v28  ;;  %v798_v62 = vadd.f32 %v1847_v50, %v1591_v37 }
 0x139   : > { %1158 = vst [vmem:[%s1613_s30 + $0xc0] sm:$0xff] %v1094_v19  ;;  %v1060_v29 = vmul.f32 %v1597_v42, %v991_v23  ;;  %vm829_vm9 = vcmp.ge.f32.partialorder %v649_v33, 0.0  ;;  %v893_v39 = vmul.f32 0.2, %v649_v33  ;;  %v1097_v17 = vadd.f32 %v1605_v48, %v1028_v36 }
 0x13a   : > { %vm861_vm10 = vcmp.ge.f32.partialorder %v777_v34, 0.0  ;;  %v925_v43 = vmul.f32 0.2, %v777_v34  ;;  %vm834_vm11 = vcmp.ge.f32.partialorder %v670_v38, 0.0  ;;  %1190 = vst [vmem:[%s1613_s30 + $0x1c0] sm:$0xff] %v1126_v24  ;;  %v662_v49 = vadd.f32 %v1591_v37, %v1849_v2 }
 0x13b   : > { %v1129_v21 = vadd.f32 %v1605_v48, %v1060_v29  ;;  %v957_v44 = vsel %vm829_vm9, %v649_v33, %v893_v39  ;;  %v898_v45 = vmul.f32 0.2, %v670_v38  ;;  %1161 = vst [vmem:[%s1613_s30 + $0xd8] sm:$0xff] %v1097_v17  ;;  %v790_v3 = vadd.f32 %v1591_v37, %v1855_v55 }
 0x13c   : > { %v1026_v47 = vmul.f32 %v1597_v42, %v957_v44  ;;  %v989_v40 = vsel %vm861_vm10, %v777_v34, %v925_v43  ;;  %vm866_vm12 = vcmp.ge.f32.partialorder %v798_v62, 0.0  ;;  %v930_v53 = vmul.f32 0.2, %v798_v62 }
 0x13d   : > { %1193 = vst [vmem:[%s1613_s30 + $0x1d8] sm:$0xff] %v1129_v21  ;;  %v1058_v51 = vmul.f32 %v1597_v42, %v989_v40  ;;  %v962_v41 = vsel %vm834_vm11, %v670_v38, %v898_v45  ;;  %vm832_vm13 = vcmp.ge.f32.partialorder %v662_v49, 0.0  ;;  %v896_v54 = vmul.f32 0.2, %v662_v49 }
 0x13e   : > { %v1095_v50 = vadd.f32 %v1605_v48, %v1026_v47  ;;  %v1031_v46 = vmul.f32 %v1597_v42, %v962_v41  ;;  %v994_v2 = vsel %vm866_vm12, %v798_v62, %v930_v53  ;;  %vm864_vm14 = vcmp.ge.f32.partialorder %v790_v3, 0.0 }
 0x13f   : > { %v1127_v59 = vadd.f32 %v1605_v48, %v1058_v51  ;;  %v928_v60 = vmul.f32 0.2, %v790_v3  ;;  %v1063_v63 = vmul.f32 %v1597_v42, %v994_v2  ;;  %v960_v30 = vsel %vm832_vm13, %v662_v49, %v896_v54 }
 0x140   : > { %1159 = vst [vmem:[%s1613_s30 + $0xc8] sm:$0xff] %v1095_v50  ;;  %v1100_v55 = vadd.f32 %v1605_v48, %v1031_v46  ;;  %v673_v8 = vadd.f32 %v1857_v58, %v1591_v37  ;;  %v1029_v52 = vmul.f32 %v1597_v42, %v960_v30  ;;  %v801_v22 = vadd.f32 %v1865_v0, %v1591_v37 }
 0x141   : > { %1191 = vst [vmem:[%s1613_s30 + $0x1c8] sm:$0xff] %v1127_v59  ;;  %v992_v4 = vsel %vm864_vm14, %v790_v3, %v928_v60  ;;  %v665_v9 = vadd.f32 %v1591_v37, %v1867_v35  ;;  %v1132_v1 = vadd.f32 %v1605_v48, %v1063_v63  ;;  %v793_v35 = vadd.f32 %v1591_v37, %v1872_v5 }
 0x142   : > { %1164 = vst [vmem:[%s1613_s30 + $0xf0] sm:$0xff] %v1100_v55  ;;  %v1061_v31 = vmul.f32 %v1597_v42, %v992_v4  ;;  %vm835_vm15 = vcmp.ge.f32.partialorder %v673_v8, 0.0  ;;  %v899_v6 = vmul.f32 0.2, %v673_v8  ;;  %v1098_v58 = vadd.f32 %v1605_v48, %v1029_v52 }
 0x143   : > { %vm867_vm0 = vcmp.ge.f32.partialorder %v801_v22, 0.0  ;;  %v931_v10 = vmul.f32 0.2, %v801_v22  ;;  %vm833_vm1 = vcmp.ge.f32.partialorder %v665_v9, 0.0  ;;  %1196 = vst [vmem:[%s1613_s30 + $0x1f0] sm:$0xff] %v1132_v1  ;;  %vm865_vm2 = vcmp.ge.f32.partialorder %v793_v35, 0.0 }
 0x144   : > { %v1130_v0 = vadd.f32 %v1605_v48, %v1061_v31  ;;  %v963_v11 = vsel %vm835_vm15, %v673_v8, %v899_v6  ;;  %v897_v7 = vmul.f32 0.2, %v665_v9  ;;  %1162 = vst [vmem:[%s1613_s30 + $0xe0] sm:$0xff] %v1098_v58  ;;  %v929_v57 = vmul.f32 0.2, %v793_v35 }
 0x145   : > { %v1032_v12 = vmul.f32 %v1597_v42, %v963_v11  ;;  %v995_v56 = vsel %vm867_vm0, %v801_v22, %v931_v10 }
 0x146   : > { %1194 = vst [vmem:[%s1613_s30 + $0x1e0] sm:$0xff] %v1130_v0  ;;  %v1064_v13 = vmul.f32 %v1597_v42, %v995_v56  ;;  %v961_v16 = vsel %vm833_vm1, %v665_v9, %v897_v7  ;;  %v993_v37 = vsel %vm865_vm2, %v793_v35, %v929_v57 }
 0x147   : > { %v1101_v61 = vadd.f32 %v1605_v48, %v1032_v12  ;;  %v1030_v20 = vmul.f32 %v1597_v42, %v961_v16  ;;  %v1062_v18 = vmul.f32 %v1597_v42, %v993_v37 }
 0x148   : > { %v1133_v14 = vadd.f32 %v1605_v48, %v1064_v13 }
 0x149   : > { %1165 = vst [vmem:[%s1613_s30 + $0xf8] sm:$0xff] %v1101_v61  ;;  %v1099_v5 = vadd.f32 %v1605_v48, %v1030_v20  ;;  %v1131_v25 = vadd.f32 %v1605_v48, %v1062_v18 }
 0x14a   : > { %1197 = vst [vmem:[%s1613_s30 + $0x1f8] sm:$0xff] %v1133_v14 }
 0x14b   : > { %1163 = vst [vmem:[%s1613_s30 + $0xe8] sm:$0xff] %v1099_v5  ;;  %1195 = vst [vmem:[%s1613_s30 + $0x1e8] sm:$0xff] %v1131_v25 }
 0x14c PF: > { %s13_s12 = sadd.s32 1, %s1482_s12  }
 0x14d   : > { %p10_p4 = scmp.ge.s32.totalorder %s13_s12, 4  }
 0x14f   :  { %12 = sbr.rel (!%p10_p4) target bundleno = 1 (0x1), region = 62 }

// kernel: discriminator_forward.6
= control target key start
LH: loop header
LB: loop body
LE: loop exit
PB: predicated region body
PF: predicated region fallthrough
CT: control target
= control target key end

     0   :  { %v820_v0 = vmov 0   ;;  %vm268_vm0 = vcmask 130048   ;;  %s1187_s1 = inlined_call_operand.vmem [shape: bf16[144,128], index: 1, kind: input, shape index: {}]   ;;  %s1188_s0 = inlined_call_operand.vmem [shape: bf16[256,144], index: 0, kind: input, shape index: {}]   ;;  %s1189_s2 = inlined_call_operand.vmem [shape: f32[3,128], index: 2, kind: input, shape index: {}]   ;;  %s1190_s3 = inlined_call_operand.vmem [shape: f32[256,128], index: 3, kind: output, shape index: {}]  }
   0x1   :  { %317 = vmatprep.subr.bf16.mxu0 %v820_v0  ;;  %744 = vmatprep.subr.bf16.mxu1 %v820_v0  ;;  %v763_v1 = vld [vmem:[%s1187_s1] sm:$0xff]   ;;  %v764_v2 = vld [vmem:[%s1187_s1 + $0x8] sm:$0xff]   ;;  %v765_v3 = vld [vmem:[%s1187_s1 + $0x10] sm:$0xff]  }
   0x2   :  { %318 = vmatpush1.bf16.msra.mxu0 %v763_v1  ;;  %753 = vmatpush1.bf16.msra.mxu1 %v763_v1  ;;  %v766_v4 = vld [vmem:[%s1187_s1 + $0x18] sm:$0xff]   ;;  %v774_v5 = vld [vmem:[%s1188_s0 + $0x4] ss:$8 sps:$4 sm:$0xff]   ;;  %v769_v9 = vld [vmem:[%s1187_s1 + $0x30] sm:$0xff]  }
   0x3   :  { %319 = vmatprep.subr.bf16.mxu0 %v820_v0  ;;  %745 = vmatprep.subr.bf16.mxu1 %v820_v0  ;;  %v777_v6 = vld [vmem:[%s1188_s0 + $0x84] ss:$8 sps:$4 sm:$0xff]   ;;  %v770_v10 = vld [vmem:[%s1187_s1 + $0x38] sm:$0xff]   ;;  %v772_v12 = vld [vmem:[%s1188_s0] ss:$8 sps:$4 sm:$0xff]  }
   0x4   :  { %726 = vmatprep.mubr.msk.bf16.mxu0 %vm268_vm0, %v774_v5  ;;  %734 = vmatprep.mubr.msk.bf16.mxu1 %vm268_vm0, %v777_v6  ;;  %v767_v7 = vld [vmem:[%s1187_s1 + $0x20] sm:$0xff]   ;;  %v768_v8 = vld [vmem:[%s1187_s1 + $0x28] sm:$0xff]   ;;  %v778_v14 = vld [vmem:[%s1188_s0 + $0x14] ss:$8 sps:$4 sm:$0xff]  }
   0x5   :  { %v771_v11 = vld [vmem:[%s1187_s1 + $0x40] sm:$0xff]   ;;  %v780_v15 = vld [vmem:[%s1188_s0 + $0x94] ss:$8 sps:$4 sm:$0xff]   ;;  %v782_v16 = vld [vmem:[%s1188_s0 + $0x10] ss:$8 sps:$4 sm:$0xff]  }
   0x6   :  { %320 = vmatpush1.bf16.msra.mxu0 %v764_v2  ;;  %754 = vmatpush1.bf16.msra.mxu1 %v764_v2  ;;  %v775_v13 = vld [vmem:[%s1188_s0 + $0x80] ss:$8 sps:$4 sm:$0xff]   ;;  %v783_v17 = vld [vmem:[%s1188_s0 + $0x90] ss:$8 sps:$4 sm:$0xff]   ;;  %v784_v18 = vld [vmem:[%s1188_s0 + $0x24] ss:$8 sps:$4 sm:$0xff]  }
   0x7   :  { %321 = vmatprep.subr.bf16.mxu0 %v820_v0  ;;  %746 = vmatprep.subr.bf16.mxu1 %v820_v0  ;;  %v786_v19 = vld [vmem:[%s1188_s0 + $0xa4] ss:$8 sps:$4 sm:$0xff]   ;;  %v788_v20 = vld [vmem:[%s1188_s0 + $0x20] ss:$8 sps:$4 sm:$0xff]   ;;  %v790_v22 = vld [vmem:[%s1188_s0 + $0x34] ss:$8 sps:$4 sm:$0xff]  }
   0x8   :  { %v789_v21 = vld [vmem:[%s1188_s0 + $0xa0] ss:$8 sps:$4 sm:$0xff]   ;;  %v792_v23 = vld [vmem:[%s1188_s0 + $0xb4] ss:$8 sps:$4 sm:$0xff]   ;;  %v794_v24 = vld [vmem:[%s1188_s0 + $0x30] ss:$8 sps:$4 sm:$0xff]  }
   0x9   :  { %v795_v25 = vld [vmem:[%s1188_s0 + $0xb0] ss:$8 sps:$4 sm:$0xff]   ;;  %v796_v26 = vld [vmem:[%s1188_s0 + $0x44] ss:$8 sps:$4 sm:$0xff]   ;;  %v800_v28 = vld [vmem:[%s1188_s0 + $0x40] ss:$8 sps:$4 sm:$0xff]  }
   0xa   :  { %322 = vmatpush1.bf16.msra.mxu0 %v765_v3  ;;  %755 = vmatpush1.bf16.msra.mxu1 %v765_v3  ;;  %v798_v27 = vld [vmem:[%s1188_s0 + $0xc4] ss:$8 sps:$4 sm:$0xff]   ;;  %v801_v29 = vld [vmem:[%s1188_s0 + $0xc0] ss:$8 sps:$4 sm:$0xff]   ;;  %v802_v30 = vld [vmem:[%s1188_s0 + $0x54] ss:$8 sps:$4 sm:$0xff]  }
   0xb   :  { %323 = vmatprep.subr.bf16.mxu0 %v820_v0  ;;  %747 = vmatprep.subr.bf16.mxu1 %v820_v0  ;;  %v804_v31 = vld [vmem:[%s1188_s0 + $0xd4] ss:$8 sps:$4 sm:$0xff]   ;;  %v806_v32 = vld [vmem:[%s1188_s0 + $0x50] ss:$8 sps:$4 sm:$0xff]   ;;  %v808_v34 = vld [vmem:[%s1188_s0 + $0x64] ss:$8 sps:$4 sm:$0xff]  }
   0xc   :  { %v807_v33 = vld [vmem:[%s1188_s0 + $0xd0] ss:$8 sps:$4 sm:$0xff]   ;;  %v810_v35 = vld [vmem:[%s1188_s0 + $0xe4] ss:$8 sps:$4 sm:$0xff]   ;;  %v812_v36 = vld [vmem:[%s1188_s0 + $0x60] ss:$8 sps:$4 sm:$0xff]  }
   0xd   :  { %v813_v37 = vld [vmem:[%s1188_s0 + $0xe0] ss:$8 sps:$4 sm:$0xff]   ;;  %v814_v38 = vld [vmem:[%s1188_s0 + $0x74] ss:$8 sps:$4 sm:$0xff]   ;;  %v818_v40 = vld [vmem:[%s1188_s0 + $0x70] ss:$8 sps:$4 sm:$0xff]  }
   0xe   :  { %324 = vmatpush1.bf16.msra.mxu0 %v766_v4  ;;  %756 = vmatpush1.bf16.msra.mxu1 %v766_v4  ;;  %v816_v39 = vld [vmem:[%s1188_s0 + $0xf4] ss:$8 sps:$4 sm:$0xff]   ;;  %v819_v41 = vld [vmem:[%s1188_s0 + $0xf0] ss:$8 sps:$4 sm:$0xff]   ;;  %v983_v42 = vld [vmem:[%s1189_s2] ss:$0 sm:$0xff] }
   0xf   :  { %325 = vmatprep.subr.bf16.mxu0 %v820_v0  ;;  %748 = vmatprep.subr.bf16.mxu1 %v820_v0  ;;  %v990_v49 = vld [vmem:[%s1189_s2 + $0x1] ss:$0 sm:$0xff]  ;;  %v997_v59 = vld [vmem:[%s1189_s2 + $0x2] ss:$0 sm:$0xff] }
  0x12   :  { %326 = vmatpush1.bf16.msra.mxu0 %v767_v7  ;;  %757 = vmatpush1.bf16.msra.mxu1 %v767_v7 }
  0x13   :  { %327 = vmatprep.subr.bf16.mxu0 %v820_v0  ;;  %749 = vmatprep.subr.bf16.mxu1 %v820_v0 }
  0x16   :  { %328 = vmatpush1.bf16.msra.mxu0 %v768_v8  ;;  %758 = vmatpush1.bf16.msra.mxu1 %v768_v8 }
  0x17   :  { %329 = vmatprep.subr.bf16.mxu0 %v820_v0  ;;  %750 = vmatprep.subr.bf16.mxu1 %v820_v0 }
  0x1a   :  { %330 = vmatpush1.bf16.msra.mxu0 %v769_v9  ;;  %759 = vmatpush1.bf16.msra.mxu1 %v769_v9 }
  0x1b   :  { %331 = vmatprep.subr.bf16.mxu0 %v820_v0  ;;  %751 = vmatprep.subr.bf16.mxu1 %v820_v0 }
  0x1e   :  { %332 = vmatpush1.bf16.msra.mxu0 %v770_v10  ;;  %760 = vmatpush1.bf16.msra.mxu1 %v770_v10 }
  0x1f   :  { %333 = vmatprep.subr.bf16.mxu0 %v820_v0  ;;  %752 = vmatprep.subr.bf16.mxu1 %v820_v0 }
  0x22   :  { %334 = vmatpush1.bf16.msra.mxu0 %v771_v11  ;;  %761 = vmatpush1.bf16.msra.mxu1 %v771_v11 }
  0x25   :  { %350 = vmatmul.mubr.bf16.vlgmr.msra.gmra.mrb[0].mxu0 %v772_v12  ;;  %414 = vmatmul.mubr.bf16.vlgmr.msra.gmra.mrb[0].mxu1 %v775_v13 }
  0x26   :  { %727 = vmatprep.mubr.msk.bf16.mxu0 %vm268_vm0, %v778_v14  ;;  %735 = vmatprep.mubr.msk.bf16.mxu1 %vm268_vm0, %v780_v15 }
  0x2d   :  { %358 = vmatmul.mubr.bf16.gmra.mrb[4].mxu0 %v782_v16  ;;  %422 = vmatmul.mubr.bf16.gmra.mrb[4].mxu1 %v783_v17 }
  0x2e   :  { %728 = vmatprep.mubr.msk.bf16.mxu0 %vm268_vm0, %v784_v18  ;;  %736 = vmatprep.mubr.msk.bf16.mxu1 %vm268_vm0, %v786_v19 }
  0x35   :  { %366 = vmatmul.mubr.bf16.gmra.mrb[8].mxu0 %v788_v20  ;;  %430 = vmatmul.mubr.bf16.gmra.mrb[8].mxu1 %v789_v21 }
  0x36   :  { %729 = vmatprep.mubr.msk.bf16.mxu0 %vm268_vm0, %v790_v22  ;;  %737 = vmatprep.mubr.msk.bf16.mxu1 %vm268_vm0, %v792_v23 }
  0x3d   :  { %374 = vmatmul.mubr.bf16.gmra.mrb[12].mxu0 %v794_v24  ;;  %438 = vmatmul.mubr.bf16.gmra.mrb[12].mxu1 %v795_v25 }
  0x3e   :  { %730 = vmatprep.mubr.msk.bf16.mxu0 %vm268_vm0, %v796_v26  ;;  %738 = vmatprep.mubr.msk.bf16.mxu1 %vm268_vm0, %v798_v27 }
  0x45   :  { %382 = vmatmul.mubr.bf16.gmra.mrb[16].mxu0 %v800_v28  ;;  %446 = vmatmul.mubr.bf16.gmra.mrb[16].mxu1 %v801_v29 }
  0x46   :  { %731 = vmatprep.mubr.msk.bf16.mxu0 %vm268_vm0, %v802_v30  ;;  %739 = vmatprep.mubr.msk.bf16.mxu1 %vm268_vm0, %v804_v31 }
  0x4d   :  { %390 = vmatmul.mubr.bf16.gmra.mrb[20].mxu0 %v806_v32  ;;  %454 = vmatmul.mubr.bf16.gmra.mrb[20].mxu1 %v807_v33 }
  0x4e   :  { %732 = vmatprep.mubr.msk.bf16.mxu0 %vm268_vm0, %v808_v34  ;;  %740 = vmatprep.mubr.msk.bf16.mxu1 %vm268_vm0, %v810_v35 }
  0x55   :  { %398 = vmatmul.mubr.bf16.gmra.mrb[24].mxu0 %v812_v36  ;;  %462 = vmatmul.mubr.bf16.gmra.mrb[24].mxu1 %v813_v37 }
  0x56   :  { %733 = vmatprep.mubr.msk.bf16.mxu0 %vm268_vm0, %v814_v38  ;;  %741 = vmatprep.mubr.msk.bf16.mxu1 %vm268_vm0, %v816_v39 }
  0x5d   :  { %406 = vmatmul.mubr.bf16.gmra.mrb[28].mxu0 %v818_v40  ;;  %470 = vmatmul.mubr.bf16.gmra.mrb[28].mxu1 %v819_v41 }
  0xf8   :  { %v351_v43 = vpop.f32.mrb[0].mxu0  ;;  %v415_v44 = vpop.f32.mrb[0].mxu1 }
  0xf9   :  { %v352_v45 = vadd.f32 %v983_v42, %v351_v43  ;;  %v416_v46 = vadd.f32 %v983_v42, %v415_v44  ;;  %v353_v47 = vpop.f32.mrb[1].mxu0  ;;  %v417_v48 = vpop.f32.mrb[1].mxu1 }
  0xfa   :  { %v354_v50 = vpop.f32.mrb[2].mxu0  ;;  %v418_v51 = vpop.f32.mrb[2].mxu1 }
  0xfb   :  { %vm478_vm1 = vcmp.ge.f32.partialorder %v352_v45, 0.0  ;;  %v510_v52 = vmul.f32 0.2, %v352_v45  ;;  %vm494_vm2 = vcmp.ge.f32.partialorder %v416_v46, 0.0  ;;  %v526_v53 = vmul.f32 0.2, %v416_v46 }
  0xfc   :  { %v355_v54 = vadd.f32 %v983_v42, %v354_v50  ;;  %v419_v55 = vadd.f32 %v983_v42, %v418_v51  ;;  %v356_v56 = vpop.f32.mrb[3].mxu0  ;;  %v420_v57 = vpop.f32.mrb[3].mxu1 }
  0xfd   :  { %v542_v58 = vsel %vm478_vm1, %v352_v45, %v510_v52  ;;  %v558_v60 = vsel %vm494_vm2, %v416_v46, %v526_v53 }
  0xfe   :  { %v579_v61 = vmul.f32 %v990_v49, %v542_v58  ;;  %v595_v62 = vmul.f32 %v990_v49, %v558_v60  ;;  %vm479_vm3 = vcmp.ge.f32.partialorder %v355_v54, 0.0  ;;  %v511_v63 = vmul.f32 0.2, %v355_v54 }
  0xff   :  { %vm495_vm4 = vcmp.ge.f32.partialorder %v419_v55, 0.0  ;;  %v527_v0 = vmul.f32 0.2, %v419_v55 }
 0x100   :  { %v616_v1 = vadd.f32 %v997_v59, %v579_v61  ;;  %v632_v2 = vadd.f32 %v997_v59, %v595_v62  ;;  %v543_v3 = vsel %vm479_vm3, %v355_v54, %v511_v63  ;;  %v359_v4 = vpop.f32.mrb[4].mxu0  ;;  %v423_v5 = vpop.f32.mrb[4].mxu1 }
 0x101   :  { %v580_v6 = vmul.f32 %v990_v49, %v543_v3  ;;  %v559_v7 = vsel %vm495_vm4, %v419_v55, %v527_v0  ;;  %v360_v8 = vadd.f32 %v983_v42, %v359_v4  ;;  %v424_v9 = vadd.f32 %v983_v42, %v423_v5  ;;  %v361_v10 = vpop.f32.mrb[5].mxu0  ;;  %v425_v11 = vpop.f32.mrb[5].mxu1 }
 0x102   :  { %648 = vst [vmem:[%s1190_s3] sm:$0xff] %v616_v1  ;;  %664 = vst [vmem:[%s1190_s3 + $0x80] sm:$0xff] %v632_v2  ;;  %v596_v12 = vmul.f32 %v990_v49, %v559_v7  ;;  %v362_v13 = vpop.f32.mrb[6].mxu0  ;;  %v426_v14 = vpop.f32.mrb[6].mxu1 }
 0x103   :  { %v617_v15 = vadd.f32 %v997_v59, %v580_v6  ;;  %vm480_vm5 = vcmp.ge.f32.partialorder %v360_v8, 0.0  ;;  %v512_v16 = vmul.f32 0.2, %v360_v8  ;;  %vm496_vm6 = vcmp.ge.f32.partialorder %v424_v9, 0.0  ;;  %v364_v17 = vpop.f32.mrb[7].mxu0  ;;  %v428_v18 = vpop.f32.mrb[7].mxu1 }
 0x104   :  { %v633_v19 = vadd.f32 %v997_v59, %v596_v12  ;;  %v528_v20 = vmul.f32 0.2, %v424_v9  ;;  %v363_v21 = vadd.f32 %v983_v42, %v362_v13  ;;  %v427_v22 = vadd.f32 %v983_v42, %v426_v14 }
 0x105   :  { %649 = vst [vmem:[%s1190_s3 + $0x8] sm:$0xff] %v617_v15  ;;  %v544_v23 = vsel %vm480_vm5, %v360_v8, %v512_v16 }
 0x106   :  { %665 = vst [vmem:[%s1190_s3 + $0x88] sm:$0xff] %v633_v19  ;;  %v581_v24 = vmul.f32 %v990_v49, %v544_v23  ;;  %v560_v25 = vsel %vm496_vm6, %v424_v9, %v528_v20  ;;  %vm481_vm7 = vcmp.ge.f32.partialorder %v363_v21, 0.0  ;;  %v513_v26 = vmul.f32 0.2, %v363_v21 }
 0x107   :  { %v597_v27 = vmul.f32 %v990_v49, %v560_v25  ;;  %vm497_vm8 = vcmp.ge.f32.partialorder %v427_v22, 0.0  ;;  %v529_v28 = vmul.f32 0.2, %v427_v22 }
 0x108   :  { %v618_v29 = vadd.f32 %v997_v59, %v581_v24  ;;  %v545_v30 = vsel %vm481_vm7, %v363_v21, %v513_v26  ;;  %v367_v31 = vpop.f32.mrb[8].mxu0  ;;  %v431_v32 = vpop.f32.mrb[8].mxu1 }
 0x109   :  { %v634_v33 = vadd.f32 %v997_v59, %v597_v27  ;;  %v582_v34 = vmul.f32 %v990_v49, %v545_v30  ;;  %v561_v35 = vsel %vm497_vm8, %v427_v22, %v529_v28  ;;  %v368_v36 = vadd.f32 %v983_v42, %v367_v31  ;;  %v369_v37 = vpop.f32.mrb[9].mxu0  ;;  %v433_v38 = vpop.f32.mrb[9].mxu1 }
 0x10a   :  { %650 = vst [vmem:[%s1190_s3 + $0x10] sm:$0xff] %v618_v29  ;;  %v598_v39 = vmul.f32 %v990_v49, %v561_v35  ;;  %v432_v40 = vadd.f32 %v983_v42, %v431_v32  ;;  %v370_v41 = vpop.f32.mrb[10].mxu0  ;;  %v434_v43 = vpop.f32.mrb[10].mxu1 }
 0x10b   :  { %666 = vst [vmem:[%s1190_s3 + $0x90] sm:$0xff] %v634_v33  ;;  %v619_v44 = vadd.f32 %v997_v59, %v582_v34  ;;  %vm482_vm9 = vcmp.ge.f32.partialorder %v368_v36, 0.0  ;;  %v514_v45 = vmul.f32 0.2, %v368_v36  ;;  %v371_v46 = vadd.f32 %v983_v42, %v370_v41  ;;  %v372_v47 = vpop.f32.mrb[11].mxu0  ;;  %v436_v48 = vpop.f32.mrb[11].mxu1 }
 0x10c   :  { %v635_v50 = vadd.f32 %v997_v59, %v598_v39  ;;  %vm498_vm10 = vcmp.ge.f32.partialorder %v432_v40, 0.0  ;;  %v530_v51 = vmul.f32 0.2, %v432_v40  ;;  %v435_v52 = vadd.f32 %v983_v42, %v434_v43 }
 0x10d   :  { %651 = vst [vmem:[%s1190_s3 + $0x18] sm:$0xff] %v619_v44  ;;  %v546_v53 = vsel %vm482_vm9, %v368_v36, %v514_v45  ;;  %vm483_vm11 = vcmp.ge.f32.partialorder %v371_v46, 0.0  ;;  %v515_v54 = vmul.f32 0.2, %v371_v46 }
 0x10e   :  { %667 = vst [vmem:[%s1190_s3 + $0x98] sm:$0xff] %v635_v50  ;;  %v583_v55 = vmul.f32 %v990_v49, %v546_v53  ;;  %v562_v56 = vsel %vm498_vm10, %v432_v40, %v530_v51  ;;  %vm499_vm12 = vcmp.ge.f32.partialorder %v435_v52, 0.0  ;;  %v531_v57 = vmul.f32 0.2, %v435_v52 }
 0x10f   :  { %v599_v58 = vmul.f32 %v990_v49, %v562_v56  ;;  %v547_v60 = vsel %vm483_vm11, %v371_v46, %v515_v54 }
 0x110   :  { %v620_v61 = vadd.f32 %v997_v59, %v583_v55  ;;  %v584_v62 = vmul.f32 %v990_v49, %v547_v60  ;;  %v563_v63 = vsel %vm499_vm12, %v435_v52, %v531_v57  ;;  %v375_v0 = vpop.f32.mrb[12].mxu0  ;;  %v439_v1 = vpop.f32.mrb[12].mxu1 }
 0x111   :  { %v636_v2 = vadd.f32 %v997_v59, %v599_v58  ;;  %v600_v3 = vmul.f32 %v990_v49, %v563_v63  ;;  %v376_v4 = vadd.f32 %v983_v42, %v375_v0  ;;  %v440_v5 = vadd.f32 %v983_v42, %v439_v1  ;;  %v377_v6 = vpop.f32.mrb[13].mxu0  ;;  %v441_v7 = vpop.f32.mrb[13].mxu1 }
 0x112   :  { %652 = vst [vmem:[%s1190_s3 + $0x20] sm:$0xff] %v620_v61  ;;  %v621_v8 = vadd.f32 %v997_v59, %v584_v62  ;;  %v378_v9 = vpop.f32.mrb[14].mxu0  ;;  %v442_v10 = vpop.f32.mrb[14].mxu1 }
 0x113   :  { %668 = vst [vmem:[%s1190_s3 + $0xa0] sm:$0xff] %v636_v2  ;;  %v637_v11 = vadd.f32 %v997_v59, %v600_v3  ;;  %vm484_vm13 = vcmp.ge.f32.partialorder %v376_v4, 0.0  ;;  %v516_v12 = vmul.f32 0.2, %v376_v4  ;;  %vm500_vm14 = vcmp.ge.f32.partialorder %v440_v5, 0.0  ;;  %v380_v13 = vpop.f32.mrb[15].mxu0 }
 0x114   :  { %v444_v14 = vpop.f32.mrb[15].mxu1  ;;  %653 = vst [vmem:[%s1190_s3 + $0x28] sm:$0xff] %v621_v8  ;;  %v532_v15 = vmul.f32 0.2, %v440_v5  ;;  %v379_v16 = vadd.f32 %v983_v42, %v378_v9  ;;  %v443_v17 = vadd.f32 %v983_v42, %v442_v10 }
 0x115   :  { %669 = vst [vmem:[%s1190_s3 + $0xa8] sm:$0xff] %v637_v11  ;;  %v548_v18 = vsel %vm484_vm13, %v376_v4, %v516_v12 }
 0x116   :  { %v585_v19 = vmul.f32 %v990_v49, %v548_v18  ;;  %v564_v20 = vsel %vm500_vm14, %v440_v5, %v532_v15  ;;  %vm485_vm15 = vcmp.ge.f32.partialorder %v379_v16, 0.0  ;;  %v517_v21 = vmul.f32 0.2, %v379_v16 }
 0x117   :  { %v601_v22 = vmul.f32 %v990_v49, %v564_v20  ;;  %vm501_vm0 = vcmp.ge.f32.partialorder %v443_v17, 0.0  ;;  %v533_v23 = vmul.f32 0.2, %v443_v17 }
 0x118   :  { %v622_v24 = vadd.f32 %v997_v59, %v585_v19  ;;  %v549_v25 = vsel %vm485_vm15, %v379_v16, %v517_v21  ;;  %v383_v26 = vpop.f32.mrb[16].mxu0  ;;  %v447_v27 = vpop.f32.mrb[16].mxu1 }
 0x119   :  { %v638_v28 = vadd.f32 %v997_v59, %v601_v22  ;;  %v586_v29 = vmul.f32 %v990_v49, %v549_v25  ;;  %v565_v30 = vsel %vm501_vm0, %v443_v17, %v533_v23  ;;  %v384_v31 = vadd.f32 %v983_v42, %v383_v26  ;;  %v385_v32 = vpop.f32.mrb[17].mxu0  ;;  %v449_v33 = vpop.f32.mrb[17].mxu1 }
 0x11a   :  { %654 = vst [vmem:[%s1190_s3 + $0x30] sm:$0xff] %v622_v24  ;;  %v602_v34 = vmul.f32 %v990_v49, %v565_v30  ;;  %v448_v35 = vadd.f32 %v983_v42, %v447_v27  ;;  %v386_v36 = vpop.f32.mrb[18].mxu0  ;;  %v450_v37 = vpop.f32.mrb[18].mxu1 }
 0x11b   :  { %670 = vst [vmem:[%s1190_s3 + $0xb0] sm:$0xff] %v638_v28  ;;  %v623_v38 = vadd.f32 %v997_v59, %v586_v29  ;;  %vm486_vm1 = vcmp.ge.f32.partialorder %v384_v31, 0.0  ;;  %v518_v39 = vmul.f32 0.2, %v384_v31  ;;  %v387_v40 = vadd.f32 %v983_v42, %v386_v36  ;;  %v388_v41 = vpop.f32.mrb[19].mxu0  ;;  %v452_v43 = vpop.f32.mrb[19].mxu1 }
 0x11c   :  { %v639_v44 = vadd.f32 %v997_v59, %v602_v34  ;;  %vm502_vm2 = vcmp.ge.f32.partialorder %v448_v35, 0.0  ;;  %v534_v45 = vmul.f32 0.2, %v448_v35  ;;  %v451_v46 = vadd.f32 %v983_v42, %v450_v37 }
 0x11d   :  { %655 = vst [vmem:[%s1190_s3 + $0x38] sm:$0xff] %v623_v38  ;;  %v550_v47 = vsel %vm486_vm1, %v384_v31, %v518_v39  ;;  %vm487_vm3 = vcmp.ge.f32.partialorder %v387_v40, 0.0  ;;  %v519_v48 = vmul.f32 0.2, %v387_v40 }
 0x11e   :  { %671 = vst [vmem:[%s1190_s3 + $0xb8] sm:$0xff] %v639_v44  ;;  %v587_v50 = vmul.f32 %v990_v49, %v550_v47  ;;  %v566_v51 = vsel %vm502_vm2, %v448_v35, %v534_v45  ;;  %vm503_vm4 = vcmp.ge.f32.partialorder %v451_v46, 0.0  ;;  %v535_v52 = vmul.f32 0.2, %v451_v46 }
 0x11f   :  { %v603_v53 = vmul.f32 %v990_v49, %v566_v51  ;;  %v551_v54 = vsel %vm487_vm3, %v387_v40, %v519_v48 }
 0x120   :  { %v624_v55 = vadd.f32 %v997_v59, %v587_v50  ;;  %v588_v56 = vmul.f32 %v990_v49, %v551_v54  ;;  %v567_v57 = vsel %vm503_vm4, %v451_v46, %v535_v52  ;;  %v391_v58 = vpop.f32.mrb[20].mxu0  ;;  %v455_v60 = vpop.f32.mrb[20].mxu1 }
 0x121   :  { %v640_v61 = vadd.f32 %v997_v59, %v603_v53  ;;  %v604_v62 = vmul.f32 %v990_v49, %v567_v57  ;;  %v392_v63 = vadd.f32 %v983_v42, %v391_v58  ;;  %v456_v0 = vadd.f32 %v983_v42, %v455_v60  ;;  %v393_v1 = vpop.f32.mrb[21].mxu0  ;;  %v457_v2 = vpop.f32.mrb[21].mxu1 }
 0x122   :  { %656 = vst [vmem:[%s1190_s3 + $0x40] sm:$0xff] %v624_v55  ;;  %v625_v3 = vadd.f32 %v997_v59, %v588_v56  ;;  %v394_v4 = vpop.f32.mrb[22].mxu0  ;;  %v458_v5 = vpop.f32.mrb[22].mxu1 }
 0x123   :  { %672 = vst [vmem:[%s1190_s3 + $0xc0] sm:$0xff] %v640_v61  ;;  %v641_v6 = vadd.f32 %v997_v59, %v604_v62  ;;  %vm488_vm5 = vcmp.ge.f32.partialorder %v392_v63, 0.0  ;;  %v520_v7 = vmul.f32 0.2, %v392_v63  ;;  %vm504_vm6 = vcmp.ge.f32.partialorder %v456_v0, 0.0  ;;  %v396_v8 = vpop.f32.mrb[23].mxu0 }
 0x124   :  { %v460_v9 = vpop.f32.mrb[23].mxu1  ;;  %657 = vst [vmem:[%s1190_s3 + $0x48] sm:$0xff] %v625_v3  ;;  %v536_v10 = vmul.f32 0.2, %v456_v0  ;;  %v395_v11 = vadd.f32 %v983_v42, %v394_v4  ;;  %v459_v12 = vadd.f32 %v983_v42, %v458_v5 }
 0x125   :  { %673 = vst [vmem:[%s1190_s3 + $0xc8] sm:$0xff] %v641_v6  ;;  %v552_v13 = vsel %vm488_vm5, %v392_v63, %v520_v7 }
 0x126   :  { %v589_v14 = vmul.f32 %v990_v49, %v552_v13  ;;  %v568_v15 = vsel %vm504_vm6, %v456_v0, %v536_v10  ;;  %vm489_vm7 = vcmp.ge.f32.partialorder %v395_v11, 0.0  ;;  %v521_v16 = vmul.f32 0.2, %v395_v11 }
 0x127   :  { %v605_v17 = vmul.f32 %v990_v49, %v568_v15  ;;  %vm505_vm8 = vcmp.ge.f32.partialorder %v459_v12, 0.0  ;;  %v537_v18 = vmul.f32 0.2, %v459_v12 }
 0x128   :  { %v626_v19 = vadd.f32 %v997_v59, %v589_v14  ;;  %v553_v20 = vsel %vm489_vm7, %v395_v11, %v521_v16  ;;  %v399_v21 = vpop.f32.mrb[24].mxu0  ;;  %v463_v22 = vpop.f32.mrb[24].mxu1 }
 0x129   :  { %v642_v23 = vadd.f32 %v997_v59, %v605_v17  ;;  %v590_v24 = vmul.f32 %v990_v49, %v553_v20  ;;  %v569_v25 = vsel %vm505_vm8, %v459_v12, %v537_v18  ;;  %v400_v26 = vadd.f32 %v983_v42, %v399_v21  ;;  %v401_v27 = vpop.f32.mrb[25].mxu0  ;;  %v465_v28 = vpop.f32.mrb[25].mxu1 }
 0x12a   :  { %658 = vst [vmem:[%s1190_s3 + $0x50] sm:$0xff] %v626_v19  ;;  %v606_v29 = vmul.f32 %v990_v49, %v569_v25  ;;  %v464_v30 = vadd.f32 %v983_v42, %v463_v22  ;;  %v402_v31 = vpop.f32.mrb[26].mxu0  ;;  %v466_v32 = vpop.f32.mrb[26].mxu1 }
 0x12b   :  { %674 = vst [vmem:[%s1190_s3 + $0xd0] sm:$0xff] %v642_v23  ;;  %v627_v33 = vadd.f32 %v997_v59, %v590_v24  ;;  %vm490_vm9 = vcmp.ge.f32.partialorder %v400_v26, 0.0  ;;  %v522_v34 = vmul.f32 0.2, %v400_v26  ;;  %v403_v35 = vadd.f32 %v983_v42, %v402_v31  ;;  %v404_v36 = vpop.f32.mrb[27].mxu0  ;;  %v468_v37 = vpop.f32.mrb[27].mxu1 }
 0x12c   :  { %v643_v38 = vadd.f32 %v997_v59, %v606_v29  ;;  %vm506_vm10 = vcmp.ge.f32.partialorder %v464_v30, 0.0  ;;  %v538_v39 = vmul.f32 0.2, %v464_v30  ;;  %v467_v40 = vadd.f32 %v983_v42, %v466_v32 }
 0x12d   :  { %659 = vst [vmem:[%s1190_s3 + $0x58] sm:$0xff] %v627_v33  ;;  %v554_v41 = vsel %vm490_vm9, %v400_v26, %v522_v34  ;;  %vm491_vm11 = vcmp.ge.f32.partialorder %v403_v35, 0.0  ;;  %v523_v43 = vmul.f32 0.2, %v403_v35 }
 0x12e   :  { %675 = vst [vmem:[%s1190_s3 + $0xd8] sm:$0xff] %v643_v38  ;;  %v591_v44 = vmul.f32 %v990_v49, %v554_v41  ;;  %v570_v45 = vsel %vm506_vm10, %v464_v30, %v538_v39  ;;  %vm507_vm12 = vcmp.ge.f32.partialorder %v467_v40, 0.0  ;;  %v539_v46 = vmul.f32 0.2, %v467_v40 }
 0x12f   :  { %v607_v47 = vmul.f32 %v990_v49, %v570_v45  ;;  %v555_v48 = vsel %vm491_vm11, %v403_v35, %v523_v43 }
 0x130   :  { %v628_v50 = vadd.f32 %v997_v59, %v591_v44  ;;  %v592_v51 = vmul.f32 %v990_v49, %v555_v48  ;;  %v571_v52 = vsel %vm507_vm12, %v467_v40, %v539_v46  ;;  %v407_v53 = vpop.f32.mrb[28].mxu0  ;;  %v471_v54 = vpop.f32.mrb[28].mxu1 }
 0x131   :  { %v644_v55 = vadd.f32 %v997_v59, %v607_v47  ;;  %v608_v56 = vmul.f32 %v990_v49, %v571_v52  ;;  %v408_v57 = vadd.f32 %v983_v42, %v407_v53  ;;  %v472_v58 = vadd.f32 %v983_v42, %v471_v54  ;;  %v409_v60 = vpop.f32.mrb[29].mxu0  ;;  %v473_v61 = vpop.f32.mrb[29].mxu1 }
 0x132   :  { %660 = vst [vmem:[%s1190_s3 + $0x60] sm:$0xff] %v628_v50  ;;  %v629_v62 = vadd.f32 %v997_v59, %v592_v51  ;;  %v410_v63 = vpop.f32.mrb[30].mxu0  ;;  %v474_v0 = vpop.f32.mrb[30].mxu1 }
 0x133   :  { %676 = vst [vmem:[%s1190_s3 + $0xe0] sm:$0xff] %v644_v55  ;;  %v645_v1 = vadd.f32 %v997_v59, %v608_v56  ;;  %vm492_vm13 = vcmp.ge.f32.partialorder %v408_v57, 0.0  ;;  %v524_v2 = vmul.f32 0.2, %v408_v57  ;;  %vm508_vm14 = vcmp.ge.f32.partialorder %v472_v58, 0.0  ;;  %v412_v3 = vpop.f32.mrb[31].mxu0 }
 0x134   :  { %v476_v4 = vpop.f32.mrb[31].mxu1  ;;  %661 = vst [vmem:[%s1190_s3 + $0x68] sm:$0xff] %v629_v62  ;;  %v540_v5 = vmul.f32 0.2, %v472_v58  ;;  %v411_v6 = vadd.f32 %v983_v42, %v410_v63  ;;  %v475_v7 = vadd.f32 %v983_v42, %v474_v0 }
 0x135   :  { %677 = vst [vmem:[%s1190_s3 + $0xe8] sm:$0xff] %v645_v1  ;;  %v556_v8 = vsel %vm492_vm13, %v408_v57, %v524_v2 }
 0x136   :  { %v593_v9 = vmul.f32 %v990_v49, %v556_v8  ;;  %v572_v10 = vsel %vm508_vm14, %v472_v58, %v540_v5  ;;  %vm493_vm15 = vcmp.ge.f32.partialorder %v411_v6, 0.0  ;;  %v525_v11 = vmul.f32 0.2, %v411_v6 }
 0x137   :  { %v609_v12 = vmul.f32 %v990_v49, %v572_v10  ;;  %vm509_vm0 = vcmp.ge.f32.partialorder %v475_v7, 0.0  ;;  %v541_v13 = vmul.f32 0.2, %v475_v7 }
 0x138   :  { %v630_v14 = vadd.f32 %v997_v59, %v593_v9  ;;  %v557_v15 = vsel %vm493_vm15, %v411_v6, %v525_v11 }
 0x139   :  { %v646_v16 = vadd.f32 %v997_v59, %v609_v12  ;;  %v594_v42 = vmul.f32 %v990_v49, %v557_v15  ;;  %v573_v17 = vsel %vm509_vm0, %v475_v7, %v541_v13 }
 0x13a   :  { %662 = vst [vmem:[%s1190_s3 + $0x70] sm:$0xff] %v630_v14  ;;  %v610_v18 = vmul.f32 %v990_v49, %v573_v17 }
 0x13b   :  { %678 = vst [vmem:[%s1190_s3 + $0xf0] sm:$0xff] %v646_v16  ;;  %v631_v19 = vadd.f32 %v997_v59, %v594_v42 }
 0x13c   :  { %v647_v20 = vadd.f32 %v997_v59, %v610_v18 }
 0x13d   :  { %663 = vst [vmem:[%s1190_s3 + $0x78] sm:$0xff] %v631_v19 }
 0x13e   :  { %679 = vst [vmem:[%s1190_s3 + $0xf8] sm:$0xff] %v647_v20 }

// kernel: discriminator_forward.7
= control target key start
LH: loop header
LB: loop body
LE: loop exit
PB: predicated region body
PF: predicated region fallthrough
CT: control target
= control target key end

     0   :  { %vm240_vm0 = vcmask 261120   ;;  %s767_s1 = inlined_call_operand.vmem [shape: bf16[288,128], index: 1, kind: input, shape index: {}]   ;;  %s768_s0 = inlined_call_operand.vmem [shape: bf16[64,288], index: 0, kind: input, shape index: {}]   ;;  %s769_s2 = inlined_call_operand.vmem [shape: f32[3,128], index: 2, kind: input, shape index: {}]   ;;  %s770_s3 = inlined_call_operand.vmem [shape: f32[64,128], index: 3, kind: output, shape index: {}]  }
   0x1   :  { %v556_v0 = vld [vmem:[%s767_s1 + $0x40] sm:$0xff]   ;;  %v558_v2 = vld [vmem:[%s767_s1 + $0x48] sm:$0xff]   ;;  %v560_v4 = vld [vmem:[%s767_s1 + $0x50] sm:$0xff]  }
   0x2   :  { %v557_v1 = vld [vmem:[%s767_s1] sm:$0xff]   ;;  %482 = vmatprep.subr.bf16.mxu0 %v556_v0  ;;  %540 = vmatprep.subr.bf16.mxu1 %v556_v0  ;;  %v559_v3 = vld [vmem:[%s767_s1 + $0x8] sm:$0xff]   ;;  %v561_v5 = vld [vmem:[%s767_s1 + $0x10] sm:$0xff]  }
   0x3   :  { %483 = vmatpush3.bf16.msra.mxu0 %v557_v1  ;;  %548 = vmatpush3.bf16.msra.mxu1 %v557_v1  ;;  %v562_v6 = vld [vmem:[%s767_s1 + $0x58] sm:$0xff]   ;;  %v564_v8 = vld [vmem:[%s767_s1 + $0x60] sm:$0xff]   ;;  %v566_v10 = vld [vmem:[%s767_s1 + $0x68] sm:$0xff]  }
   0x4   :  { %484 = vmatprep.subr.bf16.mxu0 %v558_v2  ;;  %541 = vmatprep.subr.bf16.mxu1 %v558_v2  ;;  %v563_v7 = vld [vmem:[%s767_s1 + $0x18] sm:$0xff]   ;;  %v565_v9 = vld [vmem:[%s767_s1 + $0x20] sm:$0xff]   ;;  %v567_v13 = vld [vmem:[%s767_s1 + $0x28] sm:$0xff]  }
   0x5   :  { %v574_v11 = vld [vmem:[%s768_s0 + $0x4] ss:$12 sps:$4 sm:$0xff]   ;;  %v577_v12 = vld [vmem:[%s768_s0 + $0x4c] ss:$12 sps:$4 sm:$0xff]   ;;  %v575_v20 = vld [vmem:[%s768_s0 + $0x48] ss:$12 sps:$4 sm:$0xff]  }
   0x6   :  { %v568_v14 = vld [vmem:[%s767_s1 + $0x70] sm:$0xff]   ;;  %285 = vmatprep.mubr.bf16.mxu0 %v574_v11  ;;  %309 = vmatprep.mubr.bf16.mxu1 %v577_v12  ;;  %v570_v16 = vld [vmem:[%s767_s1 + $0x78] sm:$0xff]   ;;  %v578_v18 = vld [vmem:[%s767_s1 + $0x80] sm:$0xff]  }
   0x7   :  { %485 = vmatpush3.bf16.msra.mxu0 %v559_v3  ;;  %549 = vmatpush3.bf16.msra.mxu1 %v559_v3  ;;  %v569_v15 = vld [vmem:[%s767_s1 + $0x30] sm:$0xff]   ;;  %v571_v17 = vld [vmem:[%s767_s1 + $0x38] sm:$0xff]   ;;  %v572_v19 = vld [vmem:[%s768_s0] ss:$12 sps:$4 sm:$0xff]  }
   0x8   :  { %486 = vmatprep.subr.bf16.mxu0 %v560_v4  ;;  %542 = vmatprep.subr.bf16.mxu1 %v560_v4  ;;  %v580_v21 = vld [vmem:[%s768_s0 + $0x1c] ss:$12 sps:$4 sm:$0xff]   ;;  %v583_v24 = vld [vmem:[%s768_s0 + $0x18] ss:$12 sps:$4 sm:$0xff]   ;;  %v584_v25 = vld [vmem:[%s768_s0 + $0x20] ss:$12 sps:$4 sm:$0xff]  }
   0x9   :  { %v579_v22 = vld [vmem:[%s767_s1 + $0x88] sm:$0xff]   ;;  %v585_v26 = vld [vmem:[%s768_s0 + $0x34] ss:$12 sps:$4 sm:$0xff]   ;;  %v587_v27 = vld [vmem:[%s768_s0 + $0x38] ss:$12 sps:$4 sm:$0xff]  }
   0xa   :  { %v582_v23 = vld [vmem:[%s768_s0 + $0x8] ss:$12 sps:$4 sm:$0xff]   ;;  %v588_v28 = vld [vmem:[%s768_s0 + $0x30] ss:$12 sps:$4 sm:$0xff]   ;;  %v707_v42 = vld [vmem:[%s769_s2] ss:$0 sm:$0xff] }
   0xb   :  { %487 = vmatpush3.bf16.msra.mxu0 %v561_v5  ;;  %550 = vmatpush3.bf16.msra.mxu1 %v561_v5  ;;  %v589_v29 = vld [vmem:[%s768_s0 + $0x50] ss:$12 sps:$4 sm:$0xff]   ;;  %v715_v56 = vld [vmem:[%s769_s2 + $0x1] ss:$0 sm:$0xff]  ;;  %v720_v61 = vld [vmem:[%s769_s2 + $0x2] ss:$0 sm:$0xff] }
   0xc   :  { %488 = vmatprep.subr.bf16.mxu0 %v562_v6  ;;  %543 = vmatprep.subr.bf16.mxu1 %v562_v6 }
   0xf   :  { %489 = vmatpush3.bf16.msra.mxu0 %v563_v7  ;;  %551 = vmatpush3.bf16.msra.mxu1 %v563_v7 }
  0x10   :  { %490 = vmatprep.subr.bf16.mxu0 %v564_v8  ;;  %544 = vmatprep.subr.bf16.mxu1 %v564_v8 }
  0x13   :  { %491 = vmatpush3.bf16.msra.mxu0 %v565_v9  ;;  %552 = vmatpush3.bf16.msra.mxu1 %v565_v9 }
  0x14   :  { %492 = vmatprep.subr.bf16.mxu0 %v566_v10  ;;  %545 = vmatprep.subr.bf16.mxu1 %v566_v10 }
  0x17   :  { %493 = vmatpush3.bf16.msra.mxu0 %v567_v13  ;;  %553 = vmatpush3.bf16.msra.mxu1 %v567_v13 }
  0x18   :  { %494 = vmatprep.subr.bf16.mxu0 %v568_v14  ;;  %546 = vmatprep.subr.bf16.mxu1 %v568_v14 }
  0x1b   :  { %495 = vmatpush3.bf16.msra.mxu0 %v569_v15  ;;  %554 = vmatpush3.bf16.msra.mxu1 %v569_v15 }
  0x1c   :  { %496 = vmatprep.subr.bf16.mxu0 %v570_v16  ;;  %547 = vmatprep.subr.bf16.mxu1 %v570_v16 }
  0x1f   :  { %497 = vmatpush3.bf16.msra.mxu0 %v571_v17  ;;  %555 = vmatpush3.bf16.msra.mxu1 %v571_v17 }
  0x20   :  { %528 = vmatprep.subr.bf16.mxu1 %v578_v18 }
  0x22   :  { %286 = vmatmul.mubr.bf16.vlgmr.msra.gmra.mrb[0].mxu0 %v572_v19  ;;  %310 = vmatmul.mubr.bf16.vlgmr.msra.gmra.mrb[0].mxu1 %v575_v20 }
  0x23   :  { %529 = vmatpush3.bf16.msra.mxu1 %v578_v18  ;;  %293 = vmatprep.mubr.bf16.mxu0 %v580_v21 }
  0x24   :  { %530 = vmatprep.subr.bf16.mxu1 %v579_v22  ;;  %532 = vmatprep.mubr.msk.bf16.mxu1 %vm240_vm0, %v582_v23 }
  0x27   :  { %531 = vmatpush3.bf16.msra.mxu1 %v579_v22 }
  0x2a   :  { %294 = vmatmul.mubr.bf16.gmra.mrb[4].mxu0 %v583_v24  ;;  %533 = vmatmul.mubr.msk.bf16.vlgmr.msra.gmra.mrb[4].mxu1 %vm240_vm0, %v584_v25 }
  0x2b   :  { %301 = vmatprep.mubr.bf16.mxu0 %v585_v26  ;;  %536 = vmatprep.mubr.msk.bf16.mxu1 %vm240_vm0, %v587_v27 }
  0x32   :  { %302 = vmatmul.mubr.bf16.gmra.mrb[8].mxu0 %v588_v28  ;;  %537 = vmatmul.mubr.msk.bf16.gmra.mrb[8].mxu1 %vm240_vm0, %v589_v29 }
  0xf5   :  { %v498_v30 = vpop.f32.mrb[0].mxu0  ;;  %v516_v31 = vpop.f32.mrb[0].mxu1 }
  0xf6   :  { %v499_v32 = vpop.f32.mrb[1].mxu0  ;;  %v517_v33 = vpop.f32.mrb[1].mxu1 }
  0xf7   :  { %v500_v34 = vadd.f32 %v499_v32, %v498_v30  ;;  %v501_v35 = vpop.f32.mrb[2].mxu0  ;;  %v518_v36 = vadd.f32 %v517_v33, %v516_v31  ;;  %v519_v37 = vpop.f32.mrb[2].mxu1 }
  0xf8   :  { %v502_v38 = vpop.f32.mrb[3].mxu0  ;;  %v520_v39 = vpop.f32.mrb[3].mxu1 }
  0xf9   :  { %v503_v40 = vadd.f32 %v502_v38, %v501_v35  ;;  %v521_v41 = vadd.f32 %v520_v39, %v519_v37  ;;  %v288_v45 = vadd.f32 %v500_v34, %v707_v42  ;;  %v312_v2 = vadd.f32 %v518_v36, %v707_v42 }
  0xfb   :  { %v291_v53 = vadd.f32 %v503_v40, %v707_v42  ;;  %v315_v12 = vadd.f32 %v521_v41, %v707_v42 }
  0xfd   :  { %v504_v43 = vpop.f32.mrb[4].mxu0  ;;  %v534_v44 = vpop.f32.mrb[4].mxu1 }
  0xfe   :  { %v505_v46 = vpop.f32.mrb[5].mxu0  ;;  %v352_v47 = vpop.f32.mrb[5].mxu1 }
  0xff   :  { %v506_v48 = vadd.f32 %v505_v46, %v504_v43  ;;  %v353_v49 = vadd.f32 %v352_v47, %v288_v45  ;;  %v507_v50 = vpop.f32.mrb[6].mxu0  ;;  %v535_v51 = vpop.f32.mrb[6].mxu1 }
 0x100   :  { %v508_v52 = vpop.f32.mrb[7].mxu0  ;;  %v355_v54 = vpop.f32.mrb[7].mxu1 }
 0x101   :  { %v296_v55 = vadd.f32 %v506_v48, %v707_v42  ;;  %vm383_vm1 = vcmp.ge.f32.partialorder %v353_v49, 0.0  ;;  %v391_v57 = vmul.f32 0.2, %v353_v49  ;;  %v509_v58 = vadd.f32 %v508_v52, %v507_v50 }
 0x102   :  { %v356_v59 = vadd.f32 %v355_v54, %v291_v53 }
 0x103   :  { %v361_v60 = vadd.f32 %v534_v44, %v296_v55  ;;  %v399_v62 = vsel %vm383_vm1, %v353_v49, %v391_v57  ;;  %v299_v63 = vadd.f32 %v509_v58, %v707_v42 }
 0x104   :  { %v412_v0 = vmul.f32 %v715_v56, %v399_v62  ;;  %vm384_vm2 = vcmp.ge.f32.partialorder %v356_v59, 0.0  ;;  %v392_v1 = vmul.f32 0.2, %v356_v59 }
 0x105   :  { %vm385_vm3 = vcmp.ge.f32.partialorder %v361_v60, 0.0  ;;  %v393_v3 = vmul.f32 0.2, %v361_v60  ;;  %v364_v4 = vadd.f32 %v535_v51, %v299_v63  ;;  %v510_v5 = vpop.f32.mrb[8].mxu0  ;;  %v538_v6 = vpop.f32.mrb[8].mxu1 }
 0x106   :  { %v425_v7 = vadd.f32 %v720_v61, %v412_v0  ;;  %v400_v8 = vsel %vm384_vm2, %v356_v59, %v392_v1  ;;  %v377_v9 = vadd.f32 %v538_v6, %v312_v2  ;;  %v511_v10 = vpop.f32.mrb[9].mxu0  ;;  %v368_v11 = vpop.f32.mrb[9].mxu1 }
 0x107   :  { %v401_v13 = vsel %vm385_vm3, %v361_v60, %v393_v3  ;;  %vm386_vm4 = vcmp.ge.f32.partialorder %v364_v4, 0.0  ;;  %v394_v14 = vmul.f32 0.2, %v364_v4  ;;  %v413_v15 = vmul.f32 %v715_v56, %v400_v8  ;;  %v513_v16 = vpop.f32.mrb[10].mxu0  ;;  %v539_v17 = vpop.f32.mrb[10].mxu1 }
 0x108   :  { %v414_v18 = vmul.f32 %v715_v56, %v401_v13  ;;  %433 = vst [vmem:[%s770_s3] sm:$0xff] %v425_v7  ;;  %vm389_vm5 = vcmp.ge.f32.partialorder %v377_v9, 0.0  ;;  %v397_v19 = vmul.f32 0.2, %v377_v9  ;;  %v512_v20 = vadd.f32 %v511_v10, %v510_v5  ;;  %v514_v21 = vpop.f32.mrb[11].mxu0  ;;  %v371_v22 = vpop.f32.mrb[11].mxu1 }
 0x109   :  { %v402_v23 = vsel %vm386_vm4, %v364_v4, %v394_v14  ;;  %v426_v24 = vadd.f32 %v720_v61, %v413_v15  ;;  %v380_v25 = vadd.f32 %v539_v17, %v315_v12  ;;  %v515_v26 = vadd.f32 %v514_v21, %v513_v16 }
 0x10a   :  { %v427_v27 = vadd.f32 %v720_v61, %v414_v18  ;;  %v415_v28 = vmul.f32 %v715_v56, %v402_v23  ;;  %v405_v29 = vsel %vm389_vm5, %v377_v9, %v397_v19  ;;  %v304_v30 = vadd.f32 %v512_v20, %v707_v42 }
 0x10b   :  { %434 = vst [vmem:[%s770_s3 + $0x8] sm:$0xff] %v426_v24  ;;  %v418_v31 = vmul.f32 %v715_v56, %v405_v29  ;;  %vm390_vm6 = vcmp.ge.f32.partialorder %v380_v25, 0.0  ;;  %v398_v32 = vmul.f32 0.2, %v380_v25  ;;  %v307_v33 = vadd.f32 %v515_v26, %v707_v42 }
 0x10c   :  { %435 = vst [vmem:[%s770_s3 + $0x10] sm:$0xff] %v427_v27  ;;  %v428_v34 = vadd.f32 %v720_v61, %v415_v28  ;;  %v369_v35 = vadd.f32 %v368_v11, %v304_v30 }
 0x10d   :  { %v431_v36 = vadd.f32 %v720_v61, %v418_v31  ;;  %v406_v37 = vsel %vm390_vm6, %v380_v25, %v398_v32  ;;  %v372_v38 = vadd.f32 %v371_v22, %v307_v33 }
 0x10e   :  { %436 = vst [vmem:[%s770_s3 + $0x18] sm:$0xff] %v428_v34  ;;  %vm387_vm7 = vcmp.ge.f32.partialorder %v369_v35, 0.0  ;;  %v395_v39 = vmul.f32 0.2, %v369_v35  ;;  %v419_v40 = vmul.f32 %v715_v56, %v406_v37 }
 0x10f   :  { %439 = vst [vmem:[%s770_s3 + $0x30] sm:$0xff] %v431_v36  ;;  %vm388_vm8 = vcmp.ge.f32.partialorder %v372_v38, 0.0  ;;  %v396_v41 = vmul.f32 0.2, %v372_v38 }
 0x110   :  { %v403_v42 = vsel %vm387_vm7, %v369_v35, %v395_v39  ;;  %v432_v43 = vadd.f32 %v720_v61, %v419_v40 }
 0x111   :  { %v416_v44 = vmul.f32 %v715_v56, %v403_v42  ;;  %v404_v45 = vsel %vm388_vm8, %v372_v38, %v396_v41 }
 0x112   :  { %440 = vst [vmem:[%s770_s3 + $0x38] sm:$0xff] %v432_v43  ;;  %v417_v46 = vmul.f32 %v715_v56, %v404_v45 }
 0x113   :  { %v429_v47 = vadd.f32 %v720_v61, %v416_v44 }
 0x114   :  { %v430_v48 = vadd.f32 %v720_v61, %v417_v46 }
 0x115   :  { %437 = vst [vmem:[%s770_s3 + $0x20] sm:$0xff] %v429_v47 }
 0x116   :  { %438 = vst [vmem:[%s770_s3 + $0x28] sm:$0xff] %v430_v48 }

// kernel: discriminator_forward.8
= control target key start
LH: loop header
LB: loop body
LE: loop exit
PB: predicated region body
PF: predicated region fallthrough
CT: control target
= control target key end

     0   :  { %v643_v33 = vmov 0.0   ;;  %vm644_vm0 = vmmov 0   ;;  %vm339_vm1 = vcmask 523264   ;;  %s803_s1 = inlined_call_operand.vmem [shape: bf16[576,128], index: 1, kind: input, shape index: {}]   ;;  %s804_s0 = inlined_call_operand.vmem [shape: bf16[16,576], index: 0, kind: input, shape index: {}]   ;;  %s805_s2 = inlined_call_operand.vmem [shape: f32[3,128], index: 2, kind: input, shape index: {}]   ;;  %s806_s3 = inlined_call_operand.vmem [shape: f32[16,128], index: 3, kind: output, shape index: {}]  }
   0x1   :  { %v600_v0 = vld [vmem:[%s803_s1 + $0x40] sm:$0xff]   ;;  %v604_v4 = vld [vmem:[%s803_s1 + $0x48] sm:$0xff]   ;;  %v608_v8 = vld [vmem:[%s803_s1 + $0x50] sm:$0xff]  }
   0x2   :  { %v601_v1 = vld [vmem:[%s803_s1] sm:$0xff]   ;;  %537 = vmatprep.subr.bf16.mxu0 %v600_v0  ;;  %v605_v5 = vld [vmem:[%s803_s1 + $0x8] sm:$0xff]   ;;  %v609_v9 = vld [vmem:[%s803_s1 + $0x10] sm:$0xff]  }
   0x3   :  { %v602_v2 = vld [vmem:[%s803_s1 + $0xc0] sm:$0xff]   ;;  %538 = vmatpush3.bf16.msra.mxu0 %v601_v1  ;;  %v606_v6 = vld [vmem:[%s803_s1 + $0xc8] sm:$0xff]   ;;  %v610_v10 = vld [vmem:[%s803_s1 + $0xd0] sm:$0xff]  }
   0x4   :  { %v603_v3 = vld [vmem:[%s803_s1 + $0x80] sm:$0xff]   ;;  %559 = vmatprep.subr.bf16.mxu1 %v602_v2  ;;  %539 = vmatprep.subr.bf16.mxu0 %v604_v4  ;;  %v607_v7 = vld [vmem:[%s803_s1 + $0x88] sm:$0xff]   ;;  %v611_v11 = vld [vmem:[%s803_s1 + $0x90] sm:$0xff]  }
   0x5   :  { %560 = vmatpush3.bf16.msra.mxu1 %v603_v3  ;;  %v612_v12 = vld [vmem:[%s803_s1 + $0x58] sm:$0xff]   ;;  %v616_v16 = vld [vmem:[%s803_s1 + $0x60] sm:$0xff]   ;;  %v620_v20 = vld [vmem:[%s803_s1 + $0x68] sm:$0xff]  }
   0x6   :  { %561 = vmatprep.subr.bf16.mxu1 %v606_v6  ;;  %v613_v13 = vld [vmem:[%s803_s1 + $0x18] sm:$0xff]   ;;  %v617_v17 = vld [vmem:[%s803_s1 + $0x20] sm:$0xff]   ;;  %v621_v21 = vld [vmem:[%s803_s1 + $0x28] sm:$0xff]  }
   0x7   :  { %540 = vmatpush3.bf16.msra.mxu0 %v605_v5  ;;  %v614_v14 = vld [vmem:[%s803_s1 + $0xd8] sm:$0xff]   ;;  %v618_v18 = vld [vmem:[%s803_s1 + $0xe0] sm:$0xff]   ;;  %v622_v22 = vld [vmem:[%s803_s1 + $0xe8] sm:$0xff]  }
   0x8   :  { %541 = vmatprep.subr.bf16.mxu0 %v608_v8  ;;  %v615_v15 = vld [vmem:[%s803_s1 + $0x98] sm:$0xff]   ;;  %v619_v19 = vld [vmem:[%s803_s1 + $0xa0] sm:$0xff]   ;;  %v623_v23 = vld [vmem:[%s803_s1 + $0xa8] sm:$0xff]  }
   0x9   :  { %562 = vmatpush3.bf16.msra.mxu1 %v607_v7  ;;  %v624_v24 = vld [vmem:[%s803_s1 + $0x70] sm:$0xff]   ;;  %v628_v28 = vld [vmem:[%s803_s1 + $0x78] sm:$0xff]   ;;  %v637_v36 = vld [vmem:[%s804_s0 + $0xc] ss:$20 sps:$4 sm:$0xff]  }
   0xa   :  { %563 = vmatprep.subr.bf16.mxu1 %v610_v10  ;;  %v625_v25 = vld [vmem:[%s803_s1 + $0x30] sm:$0xff]   ;;  %v629_v29 = vld [vmem:[%s803_s1 + $0x38] sm:$0xff]   ;;  %v638_v37 = vld [vmem:[%s803_s1 + $0x100] sm:$0xff]   ;;  %416 = vmatprep.mubr.bf16.mxu1 %v637_v36 }
   0xb   :  { %542 = vmatpush3.bf16.msra.mxu0 %v609_v9  ;;  %v626_v26 = vld [vmem:[%s803_s1 + $0xf0] sm:$0xff]   ;;  %v630_v30 = vld [vmem:[%s803_s1 + $0xf8] sm:$0xff]   ;;  %v639_v38 = vld [vmem:[%s803_s1 + $0x108] sm:$0xff]  }
   0xc   :  { %543 = vmatprep.subr.bf16.mxu0 %v612_v12  ;;  %v627_v27 = vld [vmem:[%s803_s1 + $0xb0] sm:$0xff]   ;;  %v633_v32 = vld [vmem:[%s804_s0 + $0x4] ss:$20 sps:$4 sm:$0xff]   ;;  %v635_v35 = vld [vmem:[%s804_s0 + $0x8] ss:$20 sps:$4 sm:$0xff]  }
   0xd   :  { %564 = vmatpush3.bf16.msra.mxu1 %v611_v11  ;;  %v631_v31 = vld [vmem:[%s804_s0] ss:$20 sps:$4 sm:$0xff]   ;;  %v634_v34 = vld [vmem:[%s803_s1 + $0xb8] sm:$0xff]   ;;  %375 = vmatprep.mubr.bf16.mxu0 %v633_v32  ;;  %v642_v41 = vld [vmem:[%s804_s0 + $0x10] ss:$20 sps:$4 sm:$0xff]  }
   0xe   :  { %565 = vmatprep.subr.bf16.mxu1 %v614_v14  ;;  %v640_v39 = vld [vmem:[%s803_s1 + $0x110] sm:$0xff]   ;;  %v641_v40 = vld [vmem:[%s803_s1 + $0x118] sm:$0xff]   ;;  %v492_v43 = vld [vmem:[%s805_s2] ss:$0 sm:$0xff] }
   0xf   :  { %544 = vmatpush3.bf16.msra.mxu0 %v613_v13  ;;  %v535_v0 = vld [vmem:[%s805_s2 + $0x1] ss:$0 sm:$0xff]  ;;  %v536_v3 = vld [vmem:[%s805_s2 + $0x2] ss:$0 sm:$0xff] }
  0x10   :  { %545 = vmatprep.subr.bf16.mxu0 %v616_v16 }
  0x11   :  { %566 = vmatpush3.bf16.msra.mxu1 %v615_v15 }
  0x12   :  { %567 = vmatprep.subr.bf16.mxu1 %v618_v18 }
  0x13   :  { %546 = vmatpush3.bf16.msra.mxu0 %v617_v17 }
  0x14   :  { %547 = vmatprep.subr.bf16.mxu0 %v620_v20 }
  0x15   :  { %568 = vmatpush3.bf16.msra.mxu1 %v619_v19 }
  0x16   :  { %569 = vmatprep.subr.bf16.mxu1 %v622_v22 }
  0x17   :  { %548 = vmatpush3.bf16.msra.mxu0 %v621_v21 }
  0x18   :  { %549 = vmatprep.subr.bf16.mxu0 %v624_v24 }
  0x19   :  { %570 = vmatpush3.bf16.msra.mxu1 %v623_v23 }
  0x1a   :  { %571 = vmatprep.subr.bf16.mxu1 %v626_v26 }
  0x1b   :  { %550 = vmatpush3.bf16.msra.mxu0 %v625_v25 }
  0x1c   :  { %551 = vmatprep.subr.bf16.mxu0 %v628_v28 }
  0x1d   :  { %572 = vmatpush3.bf16.msra.mxu1 %v627_v27 }
  0x1e   :  { %573 = vmatprep.subr.bf16.mxu1 %v630_v30 }
  0x1f   :  { %552 = vmatpush3.bf16.msra.mxu0 %v629_v29 }
  0x20   :  { %586 = vmatprep.subr.bf16.mxu0 %v643_v33 }
  0x21   :  { %574 = vmatpush3.bf16.msra.mxu1 %v634_v34 }
  0x22   :  { %376 = vmatmul.mubr.bf16.vlgmr.msra.gmra.mrb[0].mxu0 %v631_v31 }
  0x23   :  { %594 = vmatprep.mubr.msk.bf16.mxu0 %vm644_vm0, %v643_v33  ;;  %587 = vmatpush3.bf16.msra.mxu0 %v638_v37 }
  0x24   :  { %417 = vmatmul.mubr.bf16.vlgmr.msra.gmra.mrb[0].mxu1 %v635_v35  ;;  %588 = vmatprep.subr.bf16.mxu0 %v643_v33 }
  0x27   :  { %589 = vmatpush3.bf16.msra.mxu0 %v639_v38 }
  0x28   :  { %590 = vmatprep.subr.bf16.mxu0 %v643_v33 }
  0x2b   :  { %591 = vmatpush3.bf16.msra.mxu0 %v640_v39 }
  0x2c   :  { %592 = vmatprep.subr.bf16.mxu0 %v643_v33 }
  0x2f   :  { %593 = vmatpush3.bf16.msra.mxu0 %v641_v40 }
  0x32   :  { %595 = vmatmul.mubr.msk.bf16.vlgmr.msra.gmra.mrb[4].mxu0 %vm339_vm1, %v642_v41 }
  0xf5   :  { %v553_v42 = vpop.f32.mrb[0].mxu0 }
  0xf6   :  { %v554_v44 = vpop.f32.mrb[1].mxu0 }
  0xf7   :  { %v555_v45 = vadd.f32 %v554_v44, %v553_v42  ;;  %v556_v46 = vpop.f32.mrb[2].mxu0  ;;  %v575_v47 = vpop.f32.mrb[0].mxu1 }
  0xf8   :  { %v557_v48 = vpop.f32.mrb[3].mxu0  ;;  %v576_v51 = vpop.f32.mrb[1].mxu1 }
  0xf9   :  { %v378_v49 = vadd.f32 %v555_v45, %v492_v43  ;;  %v558_v50 = vadd.f32 %v557_v48, %v556_v46  ;;  %v577_v52 = vadd.f32 %v576_v51, %v575_v47  ;;  %v578_v53 = vpop.f32.mrb[2].mxu1 }
  0xfa   :  { %v579_v55 = vpop.f32.mrb[3].mxu1 }
  0xfb   :  { %v381_v54 = vadd.f32 %v558_v50, %v492_v43  ;;  %v580_v56 = vadd.f32 %v579_v55, %v578_v53  ;;  %v419_v57 = vadd.f32 %v577_v52, %v378_v49 }
  0xfd   :  { %v422_v58 = vadd.f32 %v580_v56, %v381_v54 }
 0x105   :  { %v459_v59 = vpop.f32.mrb[4].mxu0 }
 0x106   :  { %v460_v60 = vadd.f32 %v459_v59, %v419_v57  ;;  %v596_v61 = vpop.f32.mrb[5].mxu0 }
 0x107   :  { %v462_v62 = vpop.f32.mrb[6].mxu0 }
 0x108   :  { %vm466_vm2 = vcmp.ge.f32.partialorder %v460_v60, 0.0  ;;  %v468_v63 = vmul.f32 0.2, %v460_v60  ;;  %v463_v1 = vadd.f32 %v462_v62, %v422_v58  ;;  %v597_v2 = vpop.f32.mrb[7].mxu0 }
 0x10a   :  { %v470_v4 = vsel %vm466_vm2, %v460_v60, %v468_v63  ;;  %vm467_vm3 = vcmp.ge.f32.partialorder %v463_v1, 0.0  ;;  %v469_v5 = vmul.f32 0.2, %v463_v1 }
 0x10b   :  { %v477_v6 = vmul.f32 %v535_v0, %v470_v4 }
 0x10c   :  { %v471_v7 = vsel %vm467_vm3, %v463_v1, %v469_v5 }
 0x10d   :  { %v484_v8 = vadd.f32 %v536_v3, %v477_v6  ;;  %v478_v9 = vmul.f32 %v535_v0, %v471_v7 }
 0x10f   :  { %486 = vst [vmem:[%s806_s3] sm:$0xff] %v484_v8  ;;  %v485_v10 = vadd.f32 %v536_v3, %v478_v9 }
 0x111   :  { %487 = vst [vmem:[%s806_s3 + $0x8] sm:$0xff] %v485_v10 }

// kernel: discriminator_forward.9
= control target key start
LH: loop header
LB: loop body
LE: loop exit
PB: predicated region body
PF: predicated region fallthrough
CT: control target
= control target key end

     0   :  { %v510_v22 = vmov 1983009808   ;;  %v94_v24 = vlaneseq  ;;  %vm389_vm0 = vcmask 3072   ;;  %s636_s1 = inlined_call_operand.vmem [shape: bf16[512,1], index: 1, kind: input, shape index: {}]   ;;  %s637_s0 = inlined_call_operand.vmem [shape: bf16[4,512], index: 0, kind: input, shape index: {}]   ;;  %s638_s2 = inlined_call_operand.<no memory space> [shape: f32[1,1], index: 2, kind: input, shape index: {}]   ;;  %s639_s3 = inlined_call_operand.vmem [shape: f32[4,1], index: 3, kind: output, shape index: {}]  }
   0x1   :  { %v473_v0 = vld [vmem:[%s636_s1 + $0x40] sm:$0xff]   ;;  %v477_v4 = vld [vmem:[%s636_s1 + $0x48] sm:$0xff]   ;;  %v481_v8 = vld [vmem:[%s636_s1 + $0x50] sm:$0xff]   ;;  %v92_v23 = vunpack.c.l.s4 %v510_v22  ;;  %v8_v44 = vstv %s638_s2 }
   0x2   :  { %v474_v1 = vld [vmem:[%s636_s1 + $0xc0] sm:$0xff]   ;;  %428 = vmatprep.subr.bf16.mxu0 %v473_v0  ;;  %v478_v5 = vld [vmem:[%s636_s1 + $0xc8] sm:$0xff]   ;;  %v482_v9 = vld [vmem:[%s636_s1 + $0xd0] sm:$0xff]   ;;  %v95_v30 = vshrl.u32 %v94_v24, 7  ;;  %9 = vst [vmem:[#allocation2] sm:$0x1] %v8_v44 }
   0x3   :  { %v475_v2 = vld [vmem:[%s636_s1] sm:$0xff]   ;;  %450 = vmatprep.subr.bf16.mxu1 %v474_v1  ;;  %v479_v6 = vld [vmem:[%s636_s1 + $0x8] sm:$0xff]   ;;  %v483_v10 = vld [vmem:[%s636_s1 + $0x10] sm:$0xff]   ;;  %v93_v29 = vunpack.c.0.s8 %v92_v23 }
   0x4   :  { %v476_v3 = vld [vmem:[%s636_s1 + $0x80] sm:$0xff]   ;;  %429 = vmatpush3.bf16.msra.mxu0 %v475_v2  ;;  %v480_v7 = vld [vmem:[%s636_s1 + $0x88] sm:$0xff]   ;;  %v484_v11 = vld [vmem:[%s636_s1 + $0x90] sm:$0xff]  }
   0x5   :  { %451 = vmatpush3.bf16.msra.mxu1 %v476_v3  ;;  %430 = vmatprep.subr.bf16.mxu0 %v477_v4  ;;  %v485_v12 = vld [vmem:[%s636_s1 + $0x58] sm:$0xff]   ;;  %v489_v16 = vld [vmem:[%s636_s1 + $0x60] sm:$0xff]   ;;  %v493_v20 = vld [vmem:[%s636_s1 + $0x68] sm:$0xff]   ;;  %v96_v35 = vsub.s32 %v93_v29, %v95_v30 }
   0x6   :  { %452 = vmatprep.subr.bf16.mxu1 %v478_v5  ;;  %v486_v13 = vld [vmem:[%s636_s1 + $0xd8] sm:$0xff]   ;;  %v490_v17 = vld [vmem:[%s636_s1 + $0xe0] sm:$0xff]   ;;  %v494_v21 = vld [vmem:[%s636_s1 + $0xe8] sm:$0xff]  }
   0x7   :  { %v487_v14 = vld [vmem:[%s636_s1 + $0x18] sm:$0xff]   ;;  %v491_v18 = vld [vmem:[%s636_s1 + $0x20] sm:$0xff]   ;;  %v495_v25 = vld [vmem:[%s636_s1 + $0x28] sm:$0xff]  }
   0x8   :  { %431 = vmatpush3.bf16.msra.mxu0 %v479_v6  ;;  %v488_v15 = vld [vmem:[%s636_s1 + $0x98] sm:$0xff]   ;;  %v492_v19 = vld [vmem:[%s636_s1 + $0xa0] sm:$0xff]   ;;  %v496_v26 = vld [vmem:[%s636_s1 + $0xa8] sm:$0xff]  }
   0x9   :  { %453 = vmatpush3.bf16.msra.mxu1 %v480_v7  ;;  %432 = vmatprep.subr.bf16.mxu0 %v481_v8  ;;  %v497_v27 = vld [vmem:[%s636_s1 + $0x70] sm:$0xff]   ;;  %v501_v33 = vld [vmem:[%s636_s1 + $0x78] sm:$0xff]   ;;  %v17_v38 = vld [vmem:[%s637_s0] sm:$0xff] }
   0xa   :  { %454 = vmatprep.subr.bf16.mxu1 %v482_v9  ;;  %v498_v28 = vld [vmem:[%s636_s1 + $0xf0] sm:$0xff]   ;;  %v502_v34 = vld [vmem:[%s636_s1 + $0xf8] sm:$0xff]   ;;  %v97_v39 = vrot.slane %v17_v38, %v96_v35  ;;  %v90_v40 = vcombine.high %v17_v38, %v17_v38  ;;  %v395_v46 = vld [vmem:[#allocation2] ss:$0 sm:$0xff] }
   0xb   :  { %v499_v31 = vld [vmem:[%s636_s1 + $0x30] sm:$0xff]   ;;  %v503_v36 = vld [vmem:[%s636_s1 + $0x38] sm:$0xff]  }
   0xc   :  { %433 = vmatpush3.bf16.msra.mxu0 %v483_v10  ;;  %v500_v32 = vld [vmem:[%s636_s1 + $0xb0] sm:$0xff]   ;;  %v504_v37 = vld [vmem:[%s636_s1 + $0xb8] sm:$0xff]   ;;  %v105_v41 = vcombine.high %v97_v39, %v97_v39  ;;  %v104_v42 = vrot.slane %v90_v40, %v96_v35 }
   0xd   :  { %455 = vmatpush3.bf16.msra.mxu1 %v484_v11  ;;  %434 = vmatprep.subr.bf16.mxu0 %v485_v12 }
   0xe   :  { %456 = vmatprep.subr.bf16.mxu1 %v486_v13  ;;  %335 = vmatprep.mubr.bf16.mxu0 %v105_v41  ;;  %v106_v43 = vcombine.high %v104_v42, %v104_v42 }
  0x10   :  { %435 = vmatpush3.bf16.msra.mxu0 %v487_v14  ;;  %375 = vmatprep.mubr.bf16.mxu1 %v106_v43 }
  0x11   :  { %457 = vmatpush3.bf16.msra.mxu1 %v488_v15  ;;  %436 = vmatprep.subr.bf16.mxu0 %v489_v16 }
  0x12   :  { %458 = vmatprep.subr.bf16.mxu1 %v490_v17 }
  0x14   :  { %437 = vmatpush3.bf16.msra.mxu0 %v491_v18 }
  0x15   :  { %459 = vmatpush3.bf16.msra.mxu1 %v492_v19  ;;  %438 = vmatprep.subr.bf16.mxu0 %v493_v20 }
  0x16   :  { %460 = vmatprep.subr.bf16.mxu1 %v494_v21 }
  0x18   :  { %439 = vmatpush3.bf16.msra.mxu0 %v495_v25 }
  0x19   :  { %461 = vmatpush3.bf16.msra.mxu1 %v496_v26  ;;  %440 = vmatprep.subr.bf16.mxu0 %v497_v27 }
  0x1a   :  { %462 = vmatprep.subr.bf16.mxu1 %v498_v28 }
  0x1c   :  { %441 = vmatpush3.bf16.msra.mxu0 %v499_v31 }
  0x1d   :  { %463 = vmatpush3.bf16.msra.mxu1 %v500_v32  ;;  %442 = vmatprep.subr.bf16.mxu0 %v501_v33 }
  0x1e   :  { %464 = vmatprep.subr.bf16.mxu1 %v502_v34 }
  0x20   :  { %443 = vmatpush3.bf16.msra.mxu0 %v503_v36 }
  0x21   :  { %465 = vmatpush3.bf16.msra.mxu1 %v504_v37 }
  0x23   :  { %336 = vmatmul.mubr.bf16.vlgmr.msra.gmra.mrb[0].mxu0 %v97_v39 }
  0x24   :  { %376 = vmatmul.mubr.bf16.vlgmr.msra.gmra.mrb[0].mxu1 %v104_v42 }
  0xf6   :  { %v444_v45 = vpop.f32.mrb[0].mxu0 }
  0xf7   :  { %v445_v47 = vpop.f32.mrb[1].mxu0  ;;  %v466_v48 = vpop.f32.mrb[0].mxu1 }
  0xf8   :  { %v446_v49 = vadd.f32 %v445_v47, %v444_v45  ;;  %v447_v50 = vpop.f32.mrb[2].mxu0  ;;  %v467_v51 = vpop.f32.mrb[1].mxu1 }
  0xf9   :  { %v448_v52 = vpop.f32.mrb[3].mxu0  ;;  %v468_v54 = vadd.f32 %v467_v51, %v466_v48  ;;  %v469_v55 = vpop.f32.mrb[2].mxu1 }
  0xfa   :  { %v338_v53 = vadd.f32 %v446_v49, %v395_v46  ;;  %v470_v56 = vpop.f32.mrb[3].mxu1 }
  0xfc   :  { %v378_v57 = vadd.f32 %v468_v54, %v338_v53 }
  0xfe   :  { %v383_v58 = vsub.f32 0.0, %v378_v57 }
 0x100   :  { %v384_v59 = vmul.f32 1.442695, %v383_v58 }
 0x102   :  { %506 = vpow2.f32 %v384_v59 }
 0x10c   :  { %v507_v60 = vpop.eup %506 }
 0x10d   :  { %v386_v61 = vadd.f32 1.0, %v507_v60 }
 0x10f   :  { %508 = vrcp.f32 %v386_v61 }
 0x119   :  { %v509_v62 = vpop.eup %508 }
 0x11a   :  { %390 = vst.msk [vmem:[%s639_s3] sm:$0xf] %vm389_vm0, %v509_v62 }

</bundles_post_ra>
